<compile_context>
chip_gen: v7x
topology: tpu7x:2x2x1
jax: 0.10.0
libtpu: 0.0.40
codegen_flags: <defaults>
</compile_context>

<pallas_src>
import functools

import jax
import jax.numpy as jnp
from jax.experimental import pallas as pl
from jax.experimental.pallas import tpu as pltpu


LANE_PAD = 128  # aligned left/right zero apron (>= W+1) so 3x3 taps never wrap


def _round_up(v, m):
    return (v + m - 1) // m * m


# ----------------------------------------------------------------------------
# Fused kernel: one batch element per grid step, everything VMEM-resident.
# ----------------------------------------------------------------------------
def _features2reco_kernel(x_ref, w0_ref, wr_ref, br_ref, w1_ref, w2_ref,
                          w3_ref, wu_ref, wv_ref, bv_ref, out_ref, *,
                          H, W, out_channels):
    HW = H * W
    eps = 1e-5

    # Lane coordinate -> column position; masks for the w-1 / w+1 taps.
    col = jax.lax.broadcasted_iota(jnp.int32, (1, HW), 1)
    wpos = col % W
    mask_l = wpos >= 1          # tap reads x[..., w-1]  (invalid at w == 0)
    mask_r = wpos <= W - 2      # tap reads x[..., w+1]  (invalid at w == W-1)

    def taps_slab(a):
        """a: (C, H*W) channels-on-sublanes -> im2col slab (9*C, H*W)."""
        C = a.shape[0]
        zpad = jnp.zeros((C, LANE_PAD), jnp.float32)
        ap = jnp.concatenate([zpad, a, zpad], axis=1)      # (C, HW + 2*LANE_PAD)
        pieces = []
        for kh in range(3):
            for kw in range(3):
                dh, dw = kh - 1, kw - 1
                start = LANE_PAD + dh * W + dw
                t = ap[:, start:start + HW]                # shifted tap, row OOB -> apron zeros
                if dw == -1:
                    t = jnp.where(mask_l, t, 0.0)          # zero the w-boundary column
                elif dw == 1:
                    t = jnp.where(mask_r, t, 0.0)
                pieces.append(t)
        return jnp.concatenate(pieces, axis=0)             # (9*C, HW), 8-aligned rows

    def conv3x3(a, w_ref_, *, norm, bias=None, residual=None):
        """3x3 SAME conv as a single MXU matmul with H*W on the lane axis."""
        y = jnp.dot(w_ref_[...], taps_slab(a),
                    preferred_element_type=jnp.float32)    # (Cout, HW)
        if bias is not None:                               # only the no-norm conv
            y = y + bias
        if norm:
            # InstanceNorm2d (affine=False): per-(sample, channel) over spatial.
            # Single pass E[x], E[x^2]; the conv bias is omitted upstream since
            # mean-subtraction removes it exactly.
            inv = jnp.float32(1.0 / HW)
            m = jnp.sum(y, axis=1, keepdims=True) * inv
            m2 = jnp.sum(y * y, axis=1, keepdims=True) * inv
            y = (y - m) * jax.lax.rsqrt(m2 - m * m + eps)
        if residual is not None:
            y = y + residual
        return y

    x = x_ref[0]                                           # (cin_pad, HW); pad rows are zero

    # ---- down ResidualUnit (Cin -> F): IN(conv1(IN(conv0(x)))) + conv1x1(x)
    c = conv3x3(x, w0_ref, norm=True)
    r = jnp.dot(wr_ref[...], x, preferred_element_type=jnp.float32) + br_ref[...]
    d = conv3x3(c, w1_ref, norm=True, residual=r)

    # ---- bottom ResidualUnit (F -> F): IN(conv3(IN(conv2(d)))) + d
    c2 = conv3x3(d, w2_ref, norm=True)
    bott = conv3x3(c2, w3_ref, norm=True, residual=d)

    # ---- SkipConnection: channel concat, in-VMEM, sublane aligned (F == 8)
    s = jnp.concatenate([d, bott], axis=0)                 # (2F, HW)

    # ---- up: stride-1 ConvTranspose == flipped 3x3 conv, then InstanceNorm.
    # Output channels are zero-padded to 8 sublanes (extra rows stay exactly 0).
    u8 = conv3x3(s, wu_ref, norm=True)                     # (8, HW)

    # ---- final ResidualUnit (out->out, conv only) with identity residual
    y = conv3x3(u8, wv_ref, norm=False, bias=bv_ref[...],
                residual=u8[:out_channels])                # (out_channels, HW)

    out_ref[0] = y.astype(out_ref.dtype)


# ----------------------------------------------------------------------------
# Host-side weight packing (HWIO -> (Cout, 9*Cin_pad), K ordered (kh, kw, ci))
# ----------------------------------------------------------------------------
def _pack_conv3x3_weight(w_hwio, cin_pad, cout_pad=None):
    _, _, cin, cout = w_hwio.shape
    cout_pad = cout if cout_pad is None else cout_pad
    w = jnp.zeros((3, 3, cin_pad, cout_pad), jnp.float32)
    w = w.at[:, :, :cin, :cout].set(w_hwio.astype(jnp.float32))
    return w.reshape(9 * cin_pad, cout_pad).T              # (cout_pad, 9*cin_pad)


# ----------------------------------------------------------------------------
# Forward pass == Features2Reco.forward  (single fused pallas_call)
# ----------------------------------------------------------------------------
def features2reco_forward(x_nchw, params):
    N, cin, H, W = x_nchw.shape
    HW = H * W
    F = params["w1"].shape[-1]                 # n_filters (multiple of 8 here)
    out_channels = params["wv"].shape[-1]
    cin_pad = _round_up(cin, 8)
    up_cout_pad = _round_up(out_channels, 8)

    # NCHW with flattened spatial IS the kernel's lane-dense (C, H*W) layout:
    # only reshapes + zero channel padding, no transposes anywhere.
    x = x_nchw.reshape(N, cin, HW).astype(jnp.float32)
    if cin_pad != cin:
        x = jnp.concatenate(
            [x, jnp.zeros((N, cin_pad - cin, HW), jnp.float32)], axis=1)

    w0 = _pack_conv3x3_weight(params["w0"], cin_pad)            # (F, 9*cin_pad)
    w1 = _pack_conv3x3_weight(params["w1"], F)                  # (F, 9F)
    w2 = _pack_conv3x3_weight(params["w2"], F)
    w3 = _pack_conv3x3_weight(params["w3"], F)
    wu = _pack_conv3x3_weight(params["wu"], 2 * F, up_cout_pad)  # (8, 9*2F)
    wv = _pack_conv3x3_weight(params["wv"], up_cout_pad)         # (out, 9*8)
    wr = jnp.zeros((cin_pad, F), jnp.float32).at[:cin].set(
        params["wr"].astype(jnp.float32)).T                      # (F, cin_pad)
    br = params["br"].reshape(F, 1).astype(jnp.float32)
    bv = params["bv"].reshape(out_channels, 1).astype(jnp.float32)
    # b0, b1, b2, b3, bu are exactly cancelled by the following InstanceNorms
    # (affine=False) and are intentionally not passed to the kernel.

    kernel = functools.partial(_features2reco_kernel, H=H, W=W,
                               out_channels=out_channels)
    full2d = lambda n: (0, 0)

    out_flat = pl.pallas_call(
        kernel,
        out_shape=jax.ShapeDtypeStruct((N, out_channels, HW), jnp.float32),
        grid=(N,),
        in_specs=[
            pl.BlockSpec((1, cin_pad, HW), lambda n: (n, 0, 0)),
            pl.BlockSpec(w0.shape, full2d),
            pl.BlockSpec(wr.shape, full2d),
            pl.BlockSpec(br.shape, full2d),
            pl.BlockSpec(w1.shape, full2d),
            pl.BlockSpec(w2.shape, full2d),
            pl.BlockSpec(w3.shape, full2d),
            pl.BlockSpec(wu.shape, full2d),
            pl.BlockSpec(wv.shape, full2d),
            pl.BlockSpec(bv.shape, full2d),
        ],
        out_specs=pl.BlockSpec((1, out_channels, HW), lambda n: (n, 0, 0)),
        compiler_params=pltpu.CompilerParams(
            dimension_semantics=("parallel",)),
    )(x, w0, wr, br, w1, w2, w3, wu, wv, bv)

    return out_flat.reshape(N, out_channels, H, W)


# ----------------------------------------------------------------------------
# Parameters (deterministic synthetic init; PyTorch OIHW conv weights are
# represented directly in HWIO; ConvTranspose handled via flip + transpose)
# ----------------------------------------------------------------------------
def init_params(key, in_channels, out_channels=2, n_filters=8):
    F = n_filters
    keys = jax.random.split(key, 14)

    def conv_w(k, cin, cout):
        return (0.1 * jax.random.normal(k, (3, 3, cin, cout))).astype(jnp.float32)

    def bias(k, cout):
        return (0.01 * jax.random.normal(k, (cout,))).astype(jnp.float32)

    p = {}
    # down ResidualUnit (Cin -> F), 2 subunits, each Conv + InstanceNorm
    p["w0"], p["b0"] = conv_w(keys[0], in_channels, F), bias(keys[1], F)
    p["w1"], p["b1"] = conv_w(keys[2], F, F), bias(keys[3], F)
    # residual path: 1x1 conv (channel change, stride 1)
    p["wr"] = (0.1 * jax.random.normal(keys[4], (in_channels, F))).astype(jnp.float32)
    p["br"] = bias(keys[5], F)
    # bottom ResidualUnit (F -> F), identity residual
    p["w2"], p["b2"] = conv_w(keys[6], F, F), bias(keys[7], F)
    p["w3"], p["b3"] = conv_w(keys[8], F, F), bias(keys[9], F)
    # up: ConvTranspose2d(2F, out, k=3, stride=1, padding=1, output_padding=0).
    # Weight layout (Cin, Cout, kH, kW); with stride 1 it equals a regular
    # 3x3 SAME conv whose HWIO weight is the spatially-flipped, channel-
    # transposed version of the transposed-conv weight.
    wt = (0.1 * jax.random.normal(keys[10], (2 * F, out_channels, 3, 3))).astype(jnp.float32)
    p["wu"] = jnp.transpose(wt[:, :, ::-1, ::-1], (2, 3, 0, 1))   # (3,3,2F,out)
    p["bu"] = bias(keys[11], out_channels)
    # final ResidualUnit (out -> out), 1 subunit, last_conv_only=True (no norm)
    p["wv"], p["bv"] = conv_w(keys[12], out_channels, out_channels), bias(keys[13], out_channels)
    return p


if __name__ == "__main__":
    key = jax.random.PRNGKey(0)
    k_x, k_p = jax.random.split(key)

    in_channels, out_channels, n_filters = 4, 2, 8
    x = jax.random.normal(k_x, (2, in_channels, 16, 16), dtype=jnp.float32)  # NCHW
    params = init_params(k_p, in_channels, out_channels, n_filters)

    fwd = jax.jit(features2reco_forward)
    out = jax.block_until_ready(fwd(x, params))
    assert out.shape == (2, out_channels, 16, 16), out.shape
    assert bool(jnp.all(jnp.isfinite(out)))
    print("KERNEL_OK")
</pallas_src>

<mosaic_0001>
module attributes {stable_mosaic.version = 11 : i64} {
  func.func @_features2reco_kernel(%arg0: i32, %arg1: memref<1x8x256xf32, #tpu.memory_space<vmem>>, %arg2: memref<8x72xf32, #tpu.memory_space<vmem>>, %arg3: memref<8x8xf32, #tpu.memory_space<vmem>>, %arg4: memref<8x1xf32, #tpu.memory_space<vmem>>, %arg5: memref<8x72xf32, #tpu.memory_space<vmem>>, %arg6: memref<8x72xf32, #tpu.memory_space<vmem>>, %arg7: memref<8x72xf32, #tpu.memory_space<vmem>>, %arg8: memref<8x144xf32, #tpu.memory_space<vmem>>, %arg9: memref<2x72xf32, #tpu.memory_space<vmem>>, %arg10: memref<2x1xf32, #tpu.memory_space<vmem>>, %arg11: memref<1x2x256xf32, #tpu.memory_space<vmem>>) attributes {dimension_semantics = [#tpu.dimension_semantics<parallel>], iteration_bounds = array<i64: 2>, scalar_prefetch = 0 : i64, scratch_operands = 0 : i64, tpu.core_type = #tpu.core_type<tc>, window_params = [{transform_indices = @transform_0, window_bounds = array<i64: 1, 8, 256>}, {pipeline_mode = #tpu.pipeline_mode<synchronous>, transform_indices = @transform_1, window_bounds = array<i64: 8, 72>}, {pipeline_mode = #tpu.pipeline_mode<synchronous>, transform_indices = @transform_2, window_bounds = array<i64: 8, 8>}, {pipeline_mode = #tpu.pipeline_mode<synchronous>, transform_indices = @transform_3, window_bounds = array<i64: 8, 1>}, {pipeline_mode = #tpu.pipeline_mode<synchronous>, transform_indices = @transform_4, window_bounds = array<i64: 8, 72>}, {pipeline_mode = #tpu.pipeline_mode<synchronous>, transform_indices = @transform_5, window_bounds = array<i64: 8, 72>}, {pipeline_mode = #tpu.pipeline_mode<synchronous>, transform_indices = @transform_6, window_bounds = array<i64: 8, 72>}, {pipeline_mode = #tpu.pipeline_mode<synchronous>, transform_indices = @transform_7, window_bounds = array<i64: 8, 144>}, {pipeline_mode = #tpu.pipeline_mode<synchronous>, transform_indices = @transform_8, window_bounds = array<i64: 2, 72>}, {pipeline_mode = #tpu.pipeline_mode<synchronous>, transform_indices = @transform_9, window_bounds = array<i64: 2, 1>}, {transform_indices = @transform_10, window_bounds = array<i64: 1, 2, 256>}]} {
    %0 = tpu.iota {dimensions = array<i32: 1>} : vector<1x256xi32>
    %c16_i32 = arith.constant 16 : i32
    %c0_i32 = arith.constant 0 : i32
    %1 = arith.cmpi eq, %c16_i32, %c0_i32 : i32
    %c1_i32 = arith.constant 1 : i32
    %2 = arith.select %1, %c1_i32, %c16_i32 : i32
    %3 = vector.broadcast %2 : i32 to vector<1x256xi32>
    %4 = arith.remsi %0, %3 : vector<1x256xi32>
    %c0_i32_0 = arith.constant 0 : i32
    %5 = vector.broadcast %c0_i32_0 : i32 to vector<1x256xi32>
    %6 = arith.cmpi ne, %4, %5 : vector<1x256xi32>
    %c0_i32_1 = arith.constant 0 : i32
    %7 = vector.broadcast %c0_i32_1 : i32 to vector<1x256xi32>
    %8 = arith.cmpi slt, %4, %7 : vector<1x256xi32>
    %c0_i32_2 = arith.constant 0 : i32
    %9 = arith.cmpi slt, %2, %c0_i32_2 : i32
    %10 = vector.broadcast %9 : i1 to vector<1x256xi1>
    %11 = vector.broadcast %10 : vector<1x256xi1> to vector<1x256xi1>
    %12 = arith.xori %8, %11 : vector<1x256xi1>
    %13 = arith.andi %12, %6 : vector<1x256xi1>
    %14 = vector.broadcast %2 : i32 to vector<1x256xi32>
    %15 = arith.addi %4, %14 : vector<1x256xi32>
    %16 = arith.select %13, %15, %4 : vector<1x256xi1>, vector<1x256xi32>
    %c1_i32_3 = arith.constant 1 : i32
    %17 = vector.broadcast %c1_i32_3 : i32 to vector<1x256xi32>
    %18 = arith.cmpi sge, %16, %17 : vector<1x256xi32>
    %c14_i32 = arith.constant 14 : i32
    %19 = vector.broadcast %c14_i32 : i32 to vector<1x256xi32>
    %20 = arith.cmpi sle, %16, %19 : vector<1x256xi32>
    %c0 = arith.constant 0 : index
    %c0_4 = arith.constant 0 : index
    %c0_5 = arith.constant 0 : index
    %21 = vector.load %arg1[%c0, %c0_4, %c0_5] : memref<1x8x256xf32, #tpu.memory_space<vmem>>, vector<1x8x256xf32>
    %22 = vector.shape_cast %21 : vector<1x8x256xf32> to vector<8x256xf32>
    %c0_6 = arith.constant 0 : index
    %c0_7 = arith.constant 0 : index
    %23 = vector.load %arg2[%c0_6, %c0_7] : memref<8x72xf32, #tpu.memory_space<vmem>>, vector<8x72xf32>
    %cst = arith.constant 0.000000e+00 : f32
    %24 = vector.broadcast %cst : f32 to vector<8x128xf32>
    %25 = tpu.concatenate %24, %22, %24 in 1 : vector<8x128xf32>, vector<8x256xf32>, vector<8x128xf32> -> vector<8x512xf32>
    %26 = vector.extract_strided_slice %25 {offsets = [0, 111], sizes = [8, 256], strides = [1, 1]} : vector<8x512xf32> to vector<8x256xf32>
    %cst_8 = arith.constant 0.000000e+00 : f32
    %27 = vector.shape_cast %18 : vector<1x256xi1> to vector<1x256xi1>
    %28 = vector.broadcast %27 : vector<1x256xi1> to vector<8x256xi1>
    %29 = vector.broadcast %cst_8 : f32 to vector<8x256xf32>
    %30 = arith.select %28, %26, %29 : vector<8x256xi1>, vector<8x256xf32>
    %31 = vector.extract_strided_slice %25 {offsets = [0, 112], sizes = [8, 256], strides = [1, 1]} : vector<8x512xf32> to vector<8x256xf32>
    %32 = vector.extract_strided_slice %25 {offsets = [0, 113], sizes = [8, 256], strides = [1, 1]} : vector<8x512xf32> to vector<8x256xf32>
    %cst_9 = arith.constant 0.000000e+00 : f32
    %33 = vector.shape_cast %20 : vector<1x256xi1> to vector<1x256xi1>
    %34 = vector.broadcast %33 : vector<1x256xi1> to vector<8x256xi1>
    %35 = vector.broadcast %cst_9 : f32 to vector<8x256xf32>
    %36 = arith.select %34, %32, %35 : vector<8x256xi1>, vector<8x256xf32>
    %37 = vector.extract_strided_slice %25 {offsets = [0, 127], sizes = [8, 256], strides = [1, 1]} : vector<8x512xf32> to vector<8x256xf32>
    %cst_10 = arith.constant 0.000000e+00 : f32
    %38 = vector.shape_cast %18 : vector<1x256xi1> to vector<1x256xi1>
    %39 = vector.broadcast %38 : vector<1x256xi1> to vector<8x256xi1>
    %40 = vector.broadcast %cst_10 : f32 to vector<8x256xf32>
    %41 = arith.select %39, %37, %40 : vector<8x256xi1>, vector<8x256xf32>
    %42 = vector.extract_strided_slice %25 {offsets = [0, 128], sizes = [8, 256], strides = [1, 1]} : vector<8x512xf32> to vector<8x256xf32>
    %43 = vector.extract_strided_slice %25 {offsets = [0, 129], sizes = [8, 256], strides = [1, 1]} : vector<8x512xf32> to vector<8x256xf32>
    %cst_11 = arith.constant 0.000000e+00 : f32
    %44 = vector.shape_cast %20 : vector<1x256xi1> to vector<1x256xi1>
    %45 = vector.broadcast %44 : vector<1x256xi1> to vector<8x256xi1>
    %46 = vector.broadcast %cst_11 : f32 to vector<8x256xf32>
    %47 = arith.select %45, %43, %46 : vector<8x256xi1>, vector<8x256xf32>
    %48 = vector.extract_strided_slice %25 {offsets = [0, 143], sizes = [8, 256], strides = [1, 1]} : vector<8x512xf32> to vector<8x256xf32>
    %cst_12 = arith.constant 0.000000e+00 : f32
    %49 = vector.shape_cast %18 : vector<1x256xi1> to vector<1x256xi1>
    %50 = vector.broadcast %49 : vector<1x256xi1> to vector<8x256xi1>
    %51 = vector.broadcast %cst_12 : f32 to vector<8x256xf32>
    %52 = arith.select %50, %48, %51 : vector<8x256xi1>, vector<8x256xf32>
    %53 = vector.extract_strided_slice %25 {offsets = [0, 144], sizes = [8, 256], strides = [1, 1]} : vector<8x512xf32> to vector<8x256xf32>
    %54 = vector.extract_strided_slice %25 {offsets = [0, 145], sizes = [8, 256], strides = [1, 1]} : vector<8x512xf32> to vector<8x256xf32>
    %cst_13 = arith.constant 0.000000e+00 : f32
    %55 = vector.shape_cast %20 : vector<1x256xi1> to vector<1x256xi1>
    %56 = vector.broadcast %55 : vector<1x256xi1> to vector<8x256xi1>
    %57 = vector.broadcast %cst_13 : f32 to vector<8x256xf32>
    %58 = arith.select %56, %54, %57 : vector<8x256xi1>, vector<8x256xf32>
    %59 = tpu.concatenate %30, %31, %36, %41, %42, %47, %52, %53, %58 in 0 : vector<8x256xf32>, vector<8x256xf32>, vector<8x256xf32>, vector<8x256xf32>, vector<8x256xf32>, vector<8x256xf32>, vector<8x256xf32>, vector<8x256xf32>, vector<8x256xf32> -> vector<72x256xf32>
    %cst_14 = arith.constant dense<0.000000e+00> : vector<8x256xf32>
    %60 = tpu.matmul %23, %59, %cst_14 {dimension_numbers = #tpu.dot_dimension_numbers<[1], [0], [0], [1], [0, 0, 1, 1], [], []>} : vector<8x72xf32>, vector<72x256xf32>, vector<8x256xf32> -> vector<8x256xf32>
    %cst_15 = arith.constant dense<0.000000e+00> : vector<8xf32>
    %61 = vector.multi_reduction <add>, %60, %cst_15 [1] : vector<8x256xf32> to vector<8xf32>
    %62 = vector.shape_cast %61 : vector<8xf32> to vector<8x1xf32>
    %cst_16 = arith.constant 3.906250e-03 : f32
    %63 = vector.broadcast %cst_16 : f32 to vector<8x1xf32>
    %64 = arith.mulf %62, %63 : vector<8x1xf32>
    %65 = arith.mulf %60, %60 : vector<8x256xf32>
    %cst_17 = arith.constant dense<0.000000e+00> : vector<8xf32>
    %66 = vector.multi_reduction <add>, %65, %cst_17 [1] : vector<8x256xf32> to vector<8xf32>
    %67 = vector.shape_cast %66 : vector<8xf32> to vector<8x1xf32>
    %cst_18 = arith.constant 3.906250e-03 : f32
    %68 = vector.broadcast %cst_18 : f32 to vector<8x1xf32>
    %69 = arith.mulf %67, %68 : vector<8x1xf32>
    %70 = vector.broadcast %64 : vector<8x1xf32> to vector<8x256xf32>
    %71 = arith.subf %60, %70 : vector<8x256xf32>
    %72 = arith.mulf %64, %64 : vector<8x1xf32>
    %73 = arith.subf %69, %72 : vector<8x1xf32>
    %cst_19 = arith.constant 9.99999974E-6 : f32
    %74 = vector.broadcast %cst_19 : f32 to vector<8x1xf32>
    %75 = arith.addf %73, %74 : vector<8x1xf32>
    %76 = math.rsqrt %75 : vector<8x1xf32>
    %77 = vector.broadcast %76 : vector<8x1xf32> to vector<8x256xf32>
    %78 = arith.mulf %71, %77 : vector<8x256xf32>
    %c0_20 = arith.constant 0 : index
    %c0_21 = arith.constant 0 : index
    %79 = vector.load %arg3[%c0_20, %c0_21] : memref<8x8xf32, #tpu.memory_space<vmem>>, vector<8x8xf32>
    %cst_22 = arith.constant dense<0.000000e+00> : vector<8x256xf32>
    %80 = tpu.matmul %79, %22, %cst_22 {dimension_numbers = #tpu.dot_dimension_numbers<[1], [0], [0], [1], [0, 0, 1, 1], [], []>} : vector<8x8xf32>, vector<8x256xf32>, vector<8x256xf32> -> vector<8x256xf32>
    %c0_23 = arith.constant 0 : index
    %c0_24 = arith.constant 0 : index
    %81 = vector.load %arg4[%c0_23, %c0_24] : memref<8x1xf32, #tpu.memory_space<vmem>>, vector<8x1xf32>
    %82 = vector.broadcast %81 : vector<8x1xf32> to vector<8x256xf32>
    %83 = arith.addf %80, %82 : vector<8x256xf32>
    %c0_25 = arith.constant 0 : index
    %c0_26 = arith.constant 0 : index
    %84 = vector.load %arg5[%c0_25, %c0_26] : memref<8x72xf32, #tpu.memory_space<vmem>>, vector<8x72xf32>
    %cst_27 = arith.constant 0.000000e+00 : f32
    %85 = vector.broadcast %cst_27 : f32 to vector<8x128xf32>
    %86 = tpu.concatenate %85, %78, %85 in 1 : vector<8x128xf32>, vector<8x256xf32>, vector<8x128xf32> -> vector<8x512xf32>
    %87 = vector.extract_strided_slice %86 {offsets = [0, 111], sizes = [8, 256], strides = [1, 1]} : vector<8x512xf32> to vector<8x256xf32>
    %cst_28 = arith.constant 0.000000e+00 : f32
    %88 = vector.shape_cast %18 : vector<1x256xi1> to vector<1x256xi1>
    %89 = vector.broadcast %88 : vector<1x256xi1> to vector<8x256xi1>
    %90 = vector.broadcast %cst_28 : f32 to vector<8x256xf32>
    %91 = arith.select %89, %87, %90 : vector<8x256xi1>, vector<8x256xf32>
    %92 = vector.extract_strided_slice %86 {offsets = [0, 112], sizes = [8, 256], strides = [1, 1]} : vector<8x512xf32> to vector<8x256xf32>
    %93 = vector.extract_strided_slice %86 {offsets = [0, 113], sizes = [8, 256], strides = [1, 1]} : vector<8x512xf32> to vector<8x256xf32>
    %cst_29 = arith.constant 0.000000e+00 : f32
    %94 = vector.shape_cast %20 : vector<1x256xi1> to vector<1x256xi1>
    %95 = vector.broadcast %94 : vector<1x256xi1> to vector<8x256xi1>
    %96 = vector.broadcast %cst_29 : f32 to vector<8x256xf32>
    %97 = arith.select %95, %93, %96 : vector<8x256xi1>, vector<8x256xf32>
    %98 = vector.extract_strided_slice %86 {offsets = [0, 127], sizes = [8, 256], strides = [1, 1]} : vector<8x512xf32> to vector<8x256xf32>
    %cst_30 = arith.constant 0.000000e+00 : f32
    %99 = vector.shape_cast %18 : vector<1x256xi1> to vector<1x256xi1>
    %100 = vector.broadcast %99 : vector<1x256xi1> to vector<8x256xi1>
    %101 = vector.broadcast %cst_30 : f32 to vector<8x256xf32>
    %102 = arith.select %100, %98, %101 : vector<8x256xi1>, vector<8x256xf32>
    %103 = vector.extract_strided_slice %86 {offsets = [0, 128], sizes = [8, 256], strides = [1, 1]} : vector<8x512xf32> to vector<8x256xf32>
    %104 = vector.extract_strided_slice %86 {offsets = [0, 129], sizes = [8, 256], strides = [1, 1]} : vector<8x512xf32> to vector<8x256xf32>
    %cst_31 = arith.constant 0.000000e+00 : f32
    %105 = vector.shape_cast %20 : vector<1x256xi1> to vector<1x256xi1>
    %106 = vector.broadcast %105 : vector<1x256xi1> to vector<8x256xi1>
    %107 = vector.broadcast %cst_31 : f32 to vector<8x256xf32>
    %108 = arith.select %106, %104, %107 : vector<8x256xi1>, vector<8x256xf32>
    %109 = vector.extract_strided_slice %86 {offsets = [0, 143], sizes = [8, 256], strides = [1, 1]} : vector<8x512xf32> to vector<8x256xf32>
    %cst_32 = arith.constant 0.000000e+00 : f32
    %110 = vector.shape_cast %18 : vector<1x256xi1> to vector<1x256xi1>
    %111 = vector.broadcast %110 : vector<1x256xi1> to vector<8x256xi1>
    %112 = vector.broadcast %cst_32 : f32 to vector<8x256xf32>
    %113 = arith.select %111, %109, %112 : vector<8x256xi1>, vector<8x256xf32>
    %114 = vector.extract_strided_slice %86 {offsets = [0, 144], sizes = [8, 256], strides = [1, 1]} : vector<8x512xf32> to vector<8x256xf32>
    %115 = vector.extract_strided_slice %86 {offsets = [0, 145], sizes = [8, 256], strides = [1, 1]} : vector<8x512xf32> to vector<8x256xf32>
    %cst_33 = arith.constant 0.000000e+00 : f32
    %116 = vector.shape_cast %20 : vector<1x256xi1> to vector<1x256xi1>
    %117 = vector.broadcast %116 : vector<1x256xi1> to vector<8x256xi1>
    %118 = vector.broadcast %cst_33 : f32 to vector<8x256xf32>
    %119 = arith.select %117, %115, %118 : vector<8x256xi1>, vector<8x256xf32>
    %120 = tpu.concatenate %91, %92, %97, %102, %103, %108, %113, %114, %119 in 0 : vector<8x256xf32>, vector<8x256xf32>, vector<8x256xf32>, vector<8x256xf32>, vector<8x256xf32>, vector<8x256xf32>, vector<8x256xf32>, vector<8x256xf32>, vector<8x256xf32> -> vector<72x256xf32>
    %cst_34 = arith.constant dense<0.000000e+00> : vector<8x256xf32>
    %121 = tpu.matmul %84, %120, %cst_34 {dimension_numbers = #tpu.dot_dimension_numbers<[1], [0], [0], [1], [0, 0, 1, 1], [], []>} : vector<8x72xf32>, vector<72x256xf32>, vector<8x256xf32> -> vector<8x256xf32>
    %cst_35 = arith.constant dense<0.000000e+00> : vector<8xf32>
    %122 = vector.multi_reduction <add>, %121, %cst_35 [1] : vector<8x256xf32> to vector<8xf32>
    %123 = vector.shape_cast %122 : vector<8xf32> to vector<8x1xf32>
    %cst_36 = arith.constant 3.906250e-03 : f32
    %124 = vector.broadcast %cst_36 : f32 to vector<8x1xf32>
    %125 = arith.mulf %123, %124 : vector<8x1xf32>
    %126 = arith.mulf %121, %121 : vector<8x256xf32>
    %cst_37 = arith.constant dense<0.000000e+00> : vector<8xf32>
    %127 = vector.multi_reduction <add>, %126, %cst_37 [1] : vector<8x256xf32> to vector<8xf32>
    %128 = vector.shape_cast %127 : vector<8xf32> to vector<8x1xf32>
    %cst_38 = arith.constant 3.906250e-03 : f32
    %129 = vector.broadcast %cst_38 : f32 to vector<8x1xf32>
    %130 = arith.mulf %128, %129 : vector<8x1xf32>
    %131 = vector.broadcast %125 : vector<8x1xf32> to vector<8x256xf32>
    %132 = arith.subf %121, %131 : vector<8x256xf32>
    %133 = arith.mulf %125, %125 : vector<8x1xf32>
    %134 = arith.subf %130, %133 : vector<8x1xf32>
    %cst_39 = arith.constant 9.99999974E-6 : f32
    %135 = vector.broadcast %cst_39 : f32 to vector<8x1xf32>
    %136 = arith.addf %134, %135 : vector<8x1xf32>
    %137 = math.rsqrt %136 : vector<8x1xf32>
    %138 = vector.broadcast %137 : vector<8x1xf32> to vector<8x256xf32>
    %139 = arith.mulf %132, %138 : vector<8x256xf32>
    %140 = arith.addf %139, %83 : vector<8x256xf32>
    %c0_40 = arith.constant 0 : index
    %c0_41 = arith.constant 0 : index
    %141 = vector.load %arg6[%c0_40, %c0_41] : memref<8x72xf32, #tpu.memory_space<vmem>>, vector<8x72xf32>
    %cst_42 = arith.constant 0.000000e+00 : f32
    %142 = vector.broadcast %cst_42 : f32 to vector<8x128xf32>
    %143 = tpu.concatenate %142, %140, %142 in 1 : vector<8x128xf32>, vector<8x256xf32>, vector<8x128xf32> -> vector<8x512xf32>
    %144 = vector.extract_strided_slice %143 {offsets = [0, 111], sizes = [8, 256], strides = [1, 1]} : vector<8x512xf32> to vector<8x256xf32>
    %cst_43 = arith.constant 0.000000e+00 : f32
    %145 = vector.shape_cast %18 : vector<1x256xi1> to vector<1x256xi1>
    %146 = vector.broadcast %145 : vector<1x256xi1> to vector<8x256xi1>
    %147 = vector.broadcast %cst_43 : f32 to vector<8x256xf32>
    %148 = arith.select %146, %144, %147 : vector<8x256xi1>, vector<8x256xf32>
    %149 = vector.extract_strided_slice %143 {offsets = [0, 112], sizes = [8, 256], strides = [1, 1]} : vector<8x512xf32> to vector<8x256xf32>
    %150 = vector.extract_strided_slice %143 {offsets = [0, 113], sizes = [8, 256], strides = [1, 1]} : vector<8x512xf32> to vector<8x256xf32>
    %cst_44 = arith.constant 0.000000e+00 : f32
    %151 = vector.shape_cast %20 : vector<1x256xi1> to vector<1x256xi1>
    %152 = vector.broadcast %151 : vector<1x256xi1> to vector<8x256xi1>
    %153 = vector.broadcast %cst_44 : f32 to vector<8x256xf32>
    %154 = arith.select %152, %150, %153 : vector<8x256xi1>, vector<8x256xf32>
    %155 = vector.extract_strided_slice %143 {offsets = [0, 127], sizes = [8, 256], strides = [1, 1]} : vector<8x512xf32> to vector<8x256xf32>
    %cst_45 = arith.constant 0.000000e+00 : f32
    %156 = vector.shape_cast %18 : vector<1x256xi1> to vector<1x256xi1>
    %157 = vector.broadcast %156 : vector<1x256xi1> to vector<8x256xi1>
    %158 = vector.broadcast %cst_45 : f32 to vector<8x256xf32>
    %159 = arith.select %157, %155, %158 : vector<8x256xi1>, vector<8x256xf32>
    %160 = vector.extract_strided_slice %143 {offsets = [0, 128], sizes = [8, 256], strides = [1, 1]} : vector<8x512xf32> to vector<8x256xf32>
    %161 = vector.extract_strided_slice %143 {offsets = [0, 129], sizes = [8, 256], strides = [1, 1]} : vector<8x512xf32> to vector<8x256xf32>
    %cst_46 = arith.constant 0.000000e+00 : f32
    %162 = vector.shape_cast %20 : vector<1x256xi1> to vector<1x256xi1>
    %163 = vector.broadcast %162 : vector<1x256xi1> to vector<8x256xi1>
    %164 = vector.broadcast %cst_46 : f32 to vector<8x256xf32>
    %165 = arith.select %163, %161, %164 : vector<8x256xi1>, vector<8x256xf32>
    %166 = vector.extract_strided_slice %143 {offsets = [0, 143], sizes = [8, 256], strides = [1, 1]} : vector<8x512xf32> to vector<8x256xf32>
    %cst_47 = arith.constant 0.000000e+00 : f32
    %167 = vector.shape_cast %18 : vector<1x256xi1> to vector<1x256xi1>
    %168 = vector.broadcast %167 : vector<1x256xi1> to vector<8x256xi1>
    %169 = vector.broadcast %cst_47 : f32 to vector<8x256xf32>
    %170 = arith.select %168, %166, %169 : vector<8x256xi1>, vector<8x256xf32>
    %171 = vector.extract_strided_slice %143 {offsets = [0, 144], sizes = [8, 256], strides = [1, 1]} : vector<8x512xf32> to vector<8x256xf32>
    %172 = vector.extract_strided_slice %143 {offsets = [0, 145], sizes = [8, 256], strides = [1, 1]} : vector<8x512xf32> to vector<8x256xf32>
    %cst_48 = arith.constant 0.000000e+00 : f32
    %173 = vector.shape_cast %20 : vector<1x256xi1> to vector<1x256xi1>
    %174 = vector.broadcast %173 : vector<1x256xi1> to vector<8x256xi1>
    %175 = vector.broadcast %cst_48 : f32 to vector<8x256xf32>
    %176 = arith.select %174, %172, %175 : vector<8x256xi1>, vector<8x256xf32>
    %177 = tpu.concatenate %148, %149, %154, %159, %160, %165, %170, %171, %176 in 0 : vector<8x256xf32>, vector<8x256xf32>, vector<8x256xf32>, vector<8x256xf32>, vector<8x256xf32>, vector<8x256xf32>, vector<8x256xf32>, vector<8x256xf32>, vector<8x256xf32> -> vector<72x256xf32>
    %cst_49 = arith.constant dense<0.000000e+00> : vector<8x256xf32>
    %178 = tpu.matmul %141, %177, %cst_49 {dimension_numbers = #tpu.dot_dimension_numbers<[1], [0], [0], [1], [0, 0, 1, 1], [], []>} : vector<8x72xf32>, vector<72x256xf32>, vector<8x256xf32> -> vector<8x256xf32>
    %cst_50 = arith.constant dense<0.000000e+00> : vector<8xf32>
    %179 = vector.multi_reduction <add>, %178, %cst_50 [1] : vector<8x256xf32> to vector<8xf32>
    %180 = vector.shape_cast %179 : vector<8xf32> to vector<8x1xf32>
    %cst_51 = arith.constant 3.906250e-03 : f32
    %181 = vector.broadcast %cst_51 : f32 to vector<8x1xf32>
    %182 = arith.mulf %180, %181 : vector<8x1xf32>
    %183 = arith.mulf %178, %178 : vector<8x256xf32>
    %cst_52 = arith.constant dense<0.000000e+00> : vector<8xf32>
    %184 = vector.multi_reduction <add>, %183, %cst_52 [1] : vector<8x256xf32> to vector<8xf32>
    %185 = vector.shape_cast %184 : vector<8xf32> to vector<8x1xf32>
    %cst_53 = arith.constant 3.906250e-03 : f32
    %186 = vector.broadcast %cst_53 : f32 to vector<8x1xf32>
    %187 = arith.mulf %185, %186 : vector<8x1xf32>
    %188 = vector.broadcast %182 : vector<8x1xf32> to vector<8x256xf32>
    %189 = arith.subf %178, %188 : vector<8x256xf32>
    %190 = arith.mulf %182, %182 : vector<8x1xf32>
    %191 = arith.subf %187, %190 : vector<8x1xf32>
    %cst_54 = arith.constant 9.99999974E-6 : f32
    %192 = vector.broadcast %cst_54 : f32 to vector<8x1xf32>
    %193 = arith.addf %191, %192 : vector<8x1xf32>
    %194 = math.rsqrt %193 : vector<8x1xf32>
    %195 = vector.broadcast %194 : vector<8x1xf32> to vector<8x256xf32>
    %196 = arith.mulf %189, %195 : vector<8x256xf32>
    %c0_55 = arith.constant 0 : index
    %c0_56 = arith.constant 0 : index
    %197 = vector.load %arg7[%c0_55, %c0_56] : memref<8x72xf32, #tpu.memory_space<vmem>>, vector<8x72xf32>
    %cst_57 = arith.constant 0.000000e+00 : f32
    %198 = vector.broadcast %cst_57 : f32 to vector<8x128xf32>
    %199 = tpu.concatenate %198, %196, %198 in 1 : vector<8x128xf32>, vector<8x256xf32>, vector<8x128xf32> -> vector<8x512xf32>
    %200 = vector.extract_strided_slice %199 {offsets = [0, 111], sizes = [8, 256], strides = [1, 1]} : vector<8x512xf32> to vector<8x256xf32>
    %cst_58 = arith.constant 0.000000e+00 : f32
    %201 = vector.shape_cast %18 : vector<1x256xi1> to vector<1x256xi1>
    %202 = vector.broadcast %201 : vector<1x256xi1> to vector<8x256xi1>
    %203 = vector.broadcast %cst_58 : f32 to vector<8x256xf32>
    %204 = arith.select %202, %200, %203 : vector<8x256xi1>, vector<8x256xf32>
    %205 = vector.extract_strided_slice %199 {offsets = [0, 112], sizes = [8, 256], strides = [1, 1]} : vector<8x512xf32> to vector<8x256xf32>
    %206 = vector.extract_strided_slice %199 {offsets = [0, 113], sizes = [8, 256], strides = [1, 1]} : vector<8x512xf32> to vector<8x256xf32>
    %cst_59 = arith.constant 0.000000e+00 : f32
    %207 = vector.shape_cast %20 : vector<1x256xi1> to vector<1x256xi1>
    %208 = vector.broadcast %207 : vector<1x256xi1> to vector<8x256xi1>
    %209 = vector.broadcast %cst_59 : f32 to vector<8x256xf32>
    %210 = arith.select %208, %206, %209 : vector<8x256xi1>, vector<8x256xf32>
    %211 = vector.extract_strided_slice %199 {offsets = [0, 127], sizes = [8, 256], strides = [1, 1]} : vector<8x512xf32> to vector<8x256xf32>
    %cst_60 = arith.constant 0.000000e+00 : f32
    %212 = vector.shape_cast %18 : vector<1x256xi1> to vector<1x256xi1>
    %213 = vector.broadcast %212 : vector<1x256xi1> to vector<8x256xi1>
    %214 = vector.broadcast %cst_60 : f32 to vector<8x256xf32>
    %215 = arith.select %213, %211, %214 : vector<8x256xi1>, vector<8x256xf32>
    %216 = vector.extract_strided_slice %199 {offsets = [0, 128], sizes = [8, 256], strides = [1, 1]} : vector<8x512xf32> to vector<8x256xf32>
    %217 = vector.extract_strided_slice %199 {offsets = [0, 129], sizes = [8, 256], strides = [1, 1]} : vector<8x512xf32> to vector<8x256xf32>
    %cst_61 = arith.constant 0.000000e+00 : f32
    %218 = vector.shape_cast %20 : vector<1x256xi1> to vector<1x256xi1>
    %219 = vector.broadcast %218 : vector<1x256xi1> to vector<8x256xi1>
    %220 = vector.broadcast %cst_61 : f32 to vector<8x256xf32>
    %221 = arith.select %219, %217, %220 : vector<8x256xi1>, vector<8x256xf32>
    %222 = vector.extract_strided_slice %199 {offsets = [0, 143], sizes = [8, 256], strides = [1, 1]} : vector<8x512xf32> to vector<8x256xf32>
    %cst_62 = arith.constant 0.000000e+00 : f32
    %223 = vector.shape_cast %18 : vector<1x256xi1> to vector<1x256xi1>
    %224 = vector.broadcast %223 : vector<1x256xi1> to vector<8x256xi1>
    %225 = vector.broadcast %cst_62 : f32 to vector<8x256xf32>
    %226 = arith.select %224, %222, %225 : vector<8x256xi1>, vector<8x256xf32>
    %227 = vector.extract_strided_slice %199 {offsets = [0, 144], sizes = [8, 256], strides = [1, 1]} : vector<8x512xf32> to vector<8x256xf32>
    %228 = vector.extract_strided_slice %199 {offsets = [0, 145], sizes = [8, 256], strides = [1, 1]} : vector<8x512xf32> to vector<8x256xf32>
    %cst_63 = arith.constant 0.000000e+00 : f32
    %229 = vector.shape_cast %20 : vector<1x256xi1> to vector<1x256xi1>
    %230 = vector.broadcast %229 : vector<1x256xi1> to vector<8x256xi1>
    %231 = vector.broadcast %cst_63 : f32 to vector<8x256xf32>
    %232 = arith.select %230, %228, %231 : vector<8x256xi1>, vector<8x256xf32>
    %233 = tpu.concatenate %204, %205, %210, %215, %216, %221, %226, %227, %232 in 0 : vector<8x256xf32>, vector<8x256xf32>, vector<8x256xf32>, vector<8x256xf32>, vector<8x256xf32>, vector<8x256xf32>, vector<8x256xf32>, vector<8x256xf32>, vector<8x256xf32> -> vector<72x256xf32>
    %cst_64 = arith.constant dense<0.000000e+00> : vector<8x256xf32>
    %234 = tpu.matmul %197, %233, %cst_64 {dimension_numbers = #tpu.dot_dimension_numbers<[1], [0], [0], [1], [0, 0, 1, 1], [], []>} : vector<8x72xf32>, vector<72x256xf32>, vector<8x256xf32> -> vector<8x256xf32>
    %cst_65 = arith.constant dense<0.000000e+00> : vector<8xf32>
    %235 = vector.multi_reduction <add>, %234, %cst_65 [1] : vector<8x256xf32> to vector<8xf32>
    %236 = vector.shape_cast %235 : vector<8xf32> to vector<8x1xf32>
    %cst_66 = arith.constant 3.906250e-03 : f32
    %237 = vector.broadcast %cst_66 : f32 to vector<8x1xf32>
    %238 = arith.mulf %236, %237 : vector<8x1xf32>
    %239 = arith.mulf %234, %234 : vector<8x256xf32>
    %cst_67 = arith.constant dense<0.000000e+00> : vector<8xf32>
    %240 = vector.multi_reduction <add>, %239, %cst_67 [1] : vector<8x256xf32> to vector<8xf32>
    %241 = vector.shape_cast %240 : vector<8xf32> to vector<8x1xf32>
    %cst_68 = arith.constant 3.906250e-03 : f32
    %242 = vector.broadcast %cst_68 : f32 to vector<8x1xf32>
    %243 = arith.mulf %241, %242 : vector<8x1xf32>
    %244 = vector.broadcast %238 : vector<8x1xf32> to vector<8x256xf32>
    %245 = arith.subf %234, %244 : vector<8x256xf32>
    %246 = arith.mulf %238, %238 : vector<8x1xf32>
    %247 = arith.subf %243, %246 : vector<8x1xf32>
    %cst_69 = arith.constant 9.99999974E-6 : f32
    %248 = vector.broadcast %cst_69 : f32 to vector<8x1xf32>
    %249 = arith.addf %247, %248 : vector<8x1xf32>
    %250 = math.rsqrt %249 : vector<8x1xf32>
    %251 = vector.broadcast %250 : vector<8x1xf32> to vector<8x256xf32>
    %252 = arith.mulf %245, %251 : vector<8x256xf32>
    %253 = arith.addf %252, %140 : vector<8x256xf32>
    %254 = tpu.concatenate %140, %253 in 0 : vector<8x256xf32>, vector<8x256xf32> -> vector<16x256xf32>
    %c0_70 = arith.constant 0 : index
    %c0_71 = arith.constant 0 : index
    %255 = vector.load %arg8[%c0_70, %c0_71] : memref<8x144xf32, #tpu.memory_space<vmem>>, vector<8x144xf32>
    %cst_72 = arith.constant 0.000000e+00 : f32
    %256 = vector.broadcast %cst_72 : f32 to vector<16x128xf32>
    %257 = tpu.concatenate %256, %254, %256 in 1 : vector<16x128xf32>, vector<16x256xf32>, vector<16x128xf32> -> vector<16x512xf32>
    %258 = vector.extract_strided_slice %257 {offsets = [0, 111], sizes = [16, 256], strides = [1, 1]} : vector<16x512xf32> to vector<16x256xf32>
    %cst_73 = arith.constant 0.000000e+00 : f32
    %259 = vector.shape_cast %18 : vector<1x256xi1> to vector<1x256xi1>
    %260 = vector.broadcast %259 : vector<1x256xi1> to vector<16x256xi1>
    %261 = vector.broadcast %cst_73 : f32 to vector<16x256xf32>
    %262 = arith.select %260, %258, %261 : vector<16x256xi1>, vector<16x256xf32>
    %263 = vector.extract_strided_slice %257 {offsets = [0, 112], sizes = [16, 256], strides = [1, 1]} : vector<16x512xf32> to vector<16x256xf32>
    %264 = vector.extract_strided_slice %257 {offsets = [0, 113], sizes = [16, 256], strides = [1, 1]} : vector<16x512xf32> to vector<16x256xf32>
    %cst_74 = arith.constant 0.000000e+00 : f32
    %265 = vector.shape_cast %20 : vector<1x256xi1> to vector<1x256xi1>
    %266 = vector.broadcast %265 : vector<1x256xi1> to vector<16x256xi1>
    %267 = vector.broadcast %cst_74 : f32 to vector<16x256xf32>
    %268 = arith.select %266, %264, %267 : vector<16x256xi1>, vector<16x256xf32>
    %269 = vector.extract_strided_slice %257 {offsets = [0, 127], sizes = [16, 256], strides = [1, 1]} : vector<16x512xf32> to vector<16x256xf32>
    %cst_75 = arith.constant 0.000000e+00 : f32
    %270 = vector.shape_cast %18 : vector<1x256xi1> to vector<1x256xi1>
    %271 = vector.broadcast %270 : vector<1x256xi1> to vector<16x256xi1>
    %272 = vector.broadcast %cst_75 : f32 to vector<16x256xf32>
    %273 = arith.select %271, %269, %272 : vector<16x256xi1>, vector<16x256xf32>
    %274 = vector.extract_strided_slice %257 {offsets = [0, 128], sizes = [16, 256], strides = [1, 1]} : vector<16x512xf32> to vector<16x256xf32>
    %275 = vector.extract_strided_slice %257 {offsets = [0, 129], sizes = [16, 256], strides = [1, 1]} : vector<16x512xf32> to vector<16x256xf32>
    %cst_76 = arith.constant 0.000000e+00 : f32
    %276 = vector.shape_cast %20 : vector<1x256xi1> to vector<1x256xi1>
    %277 = vector.broadcast %276 : vector<1x256xi1> to vector<16x256xi1>
    %278 = vector.broadcast %cst_76 : f32 to vector<16x256xf32>
    %279 = arith.select %277, %275, %278 : vector<16x256xi1>, vector<16x256xf32>
    %280 = vector.extract_strided_slice %257 {offsets = [0, 143], sizes = [16, 256], strides = [1, 1]} : vector<16x512xf32> to vector<16x256xf32>
    %cst_77 = arith.constant 0.000000e+00 : f32
    %281 = vector.shape_cast %18 : vector<1x256xi1> to vector<1x256xi1>
    %282 = vector.broadcast %281 : vector<1x256xi1> to vector<16x256xi1>
    %283 = vector.broadcast %cst_77 : f32 to vector<16x256xf32>
    %284 = arith.select %282, %280, %283 : vector<16x256xi1>, vector<16x256xf32>
    %285 = vector.extract_strided_slice %257 {offsets = [0, 144], sizes = [16, 256], strides = [1, 1]} : vector<16x512xf32> to vector<16x256xf32>
    %286 = vector.extract_strided_slice %257 {offsets = [0, 145], sizes = [16, 256], strides = [1, 1]} : vector<16x512xf32> to vector<16x256xf32>
    %cst_78 = arith.constant 0.000000e+00 : f32
    %287 = vector.shape_cast %20 : vector<1x256xi1> to vector<1x256xi1>
    %288 = vector.broadcast %287 : vector<1x256xi1> to vector<16x256xi1>
    %289 = vector.broadcast %cst_78 : f32 to vector<16x256xf32>
    %290 = arith.select %288, %286, %289 : vector<16x256xi1>, vector<16x256xf32>
    %291 = tpu.concatenate %262, %263, %268, %273, %274, %279, %284, %285, %290 in 0 : vector<16x256xf32>, vector<16x256xf32>, vector<16x256xf32>, vector<16x256xf32>, vector<16x256xf32>, vector<16x256xf32>, vector<16x256xf32>, vector<16x256xf32>, vector<16x256xf32> -> vector<144x256xf32>
    %cst_79 = arith.constant dense<0.000000e+00> : vector<8x256xf32>
    %292 = tpu.matmul %255, %291, %cst_79 {dimension_numbers = #tpu.dot_dimension_numbers<[1], [0], [0], [1], [0, 0, 1, 1], [], []>} : vector<8x144xf32>, vector<144x256xf32>, vector<8x256xf32> -> vector<8x256xf32>
    %cst_80 = arith.constant dense<0.000000e+00> : vector<8xf32>
    %293 = vector.multi_reduction <add>, %292, %cst_80 [1] : vector<8x256xf32> to vector<8xf32>
    %294 = vector.shape_cast %293 : vector<8xf32> to vector<8x1xf32>
    %cst_81 = arith.constant 3.906250e-03 : f32
    %295 = vector.broadcast %cst_81 : f32 to vector<8x1xf32>
    %296 = arith.mulf %294, %295 : vector<8x1xf32>
    %297 = arith.mulf %292, %292 : vector<8x256xf32>
    %cst_82 = arith.constant dense<0.000000e+00> : vector<8xf32>
    %298 = vector.multi_reduction <add>, %297, %cst_82 [1] : vector<8x256xf32> to vector<8xf32>
    %299 = vector.shape_cast %298 : vector<8xf32> to vector<8x1xf32>
    %cst_83 = arith.constant 3.906250e-03 : f32
    %300 = vector.broadcast %cst_83 : f32 to vector<8x1xf32>
    %301 = arith.mulf %299, %300 : vector<8x1xf32>
    %302 = vector.broadcast %296 : vector<8x1xf32> to vector<8x256xf32>
    %303 = arith.subf %292, %302 : vector<8x256xf32>
    %304 = arith.mulf %296, %296 : vector<8x1xf32>
    %305 = arith.subf %301, %304 : vector<8x1xf32>
    %cst_84 = arith.constant 9.99999974E-6 : f32
    %306 = vector.broadcast %cst_84 : f32 to vector<8x1xf32>
    %307 = arith.addf %305, %306 : vector<8x1xf32>
    %308 = math.rsqrt %307 : vector<8x1xf32>
    %309 = vector.broadcast %308 : vector<8x1xf32> to vector<8x256xf32>
    %310 = arith.mulf %303, %309 : vector<8x256xf32>
    %c0_85 = arith.constant 0 : index
    %c0_86 = arith.constant 0 : index
    %311 = vector.load %arg10[%c0_85, %c0_86] : memref<2x1xf32, #tpu.memory_space<vmem>>, vector<2x1xf32>
    %312 = vector.extract_strided_slice %310 {offsets = [0, 0], sizes = [2, 256], strides = [1, 1]} : vector<8x256xf32> to vector<2x256xf32>
    %c0_87 = arith.constant 0 : index
    %c0_88 = arith.constant 0 : index
    %313 = vector.load %arg9[%c0_87, %c0_88] : memref<2x72xf32, #tpu.memory_space<vmem>>, vector<2x72xf32>
    %cst_89 = arith.constant 0.000000e+00 : f32
    %314 = vector.broadcast %cst_89 : f32 to vector<8x128xf32>
    %315 = tpu.concatenate %314, %310, %314 in 1 : vector<8x128xf32>, vector<8x256xf32>, vector<8x128xf32> -> vector<8x512xf32>
    %316 = vector.extract_strided_slice %315 {offsets = [0, 111], sizes = [8, 256], strides = [1, 1]} : vector<8x512xf32> to vector<8x256xf32>
    %cst_90 = arith.constant 0.000000e+00 : f32
    %317 = vector.shape_cast %18 : vector<1x256xi1> to vector<1x256xi1>
    %318 = vector.broadcast %317 : vector<1x256xi1> to vector<8x256xi1>
    %319 = vector.broadcast %cst_90 : f32 to vector<8x256xf32>
    %320 = arith.select %318, %316, %319 : vector<8x256xi1>, vector<8x256xf32>
    %321 = vector.extract_strided_slice %315 {offsets = [0, 112], sizes = [8, 256], strides = [1, 1]} : vector<8x512xf32> to vector<8x256xf32>
    %322 = vector.extract_strided_slice %315 {offsets = [0, 113], sizes = [8, 256], strides = [1, 1]} : vector<8x512xf32> to vector<8x256xf32>
    %cst_91 = arith.constant 0.000000e+00 : f32
    %323 = vector.shape_cast %20 : vector<1x256xi1> to vector<1x256xi1>
    %324 = vector.broadcast %323 : vector<1x256xi1> to vector<8x256xi1>
    %325 = vector.broadcast %cst_91 : f32 to vector<8x256xf32>
    %326 = arith.select %324, %322, %325 : vector<8x256xi1>, vector<8x256xf32>
    %327 = vector.extract_strided_slice %315 {offsets = [0, 127], sizes = [8, 256], strides = [1, 1]} : vector<8x512xf32> to vector<8x256xf32>
    %cst_92 = arith.constant 0.000000e+00 : f32
    %328 = vector.shape_cast %18 : vector<1x256xi1> to vector<1x256xi1>
    %329 = vector.broadcast %328 : vector<1x256xi1> to vector<8x256xi1>
    %330 = vector.broadcast %cst_92 : f32 to vector<8x256xf32>
    %331 = arith.select %329, %327, %330 : vector<8x256xi1>, vector<8x256xf32>
    %332 = vector.extract_strided_slice %315 {offsets = [0, 128], sizes = [8, 256], strides = [1, 1]} : vector<8x512xf32> to vector<8x256xf32>
    %333 = vector.extract_strided_slice %315 {offsets = [0, 129], sizes = [8, 256], strides = [1, 1]} : vector<8x512xf32> to vector<8x256xf32>
    %cst_93 = arith.constant 0.000000e+00 : f32
    %334 = vector.shape_cast %20 : vector<1x256xi1> to vector<1x256xi1>
    %335 = vector.broadcast %334 : vector<1x256xi1> to vector<8x256xi1>
    %336 = vector.broadcast %cst_93 : f32 to vector<8x256xf32>
    %337 = arith.select %335, %333, %336 : vector<8x256xi1>, vector<8x256xf32>
    %338 = vector.extract_strided_slice %315 {offsets = [0, 143], sizes = [8, 256], strides = [1, 1]} : vector<8x512xf32> to vector<8x256xf32>
    %cst_94 = arith.constant 0.000000e+00 : f32
    %339 = vector.shape_cast %18 : vector<1x256xi1> to vector<1x256xi1>
    %340 = vector.broadcast %339 : vector<1x256xi1> to vector<8x256xi1>
    %341 = vector.broadcast %cst_94 : f32 to vector<8x256xf32>
    %342 = arith.select %340, %338, %341 : vector<8x256xi1>, vector<8x256xf32>
    %343 = vector.extract_strided_slice %315 {offsets = [0, 144], sizes = [8, 256], strides = [1, 1]} : vector<8x512xf32> to vector<8x256xf32>
    %344 = vector.extract_strided_slice %315 {offsets = [0, 145], sizes = [8, 256], strides = [1, 1]} : vector<8x512xf32> to vector<8x256xf32>
    %cst_95 = arith.constant 0.000000e+00 : f32
    %345 = vector.shape_cast %20 : vector<1x256xi1> to vector<1x256xi1>
    %346 = vector.broadcast %345 : vector<1x256xi1> to vector<8x256xi1>
    %347 = vector.broadcast %cst_95 : f32 to vector<8x256xf32>
    %348 = arith.select %346, %344, %347 : vector<8x256xi1>, vector<8x256xf32>
    %349 = tpu.concatenate %320, %321, %326, %331, %332, %337, %342, %343, %348 in 0 : vector<8x256xf32>, vector<8x256xf32>, vector<8x256xf32>, vector<8x256xf32>, vector<8x256xf32>, vector<8x256xf32>, vector<8x256xf32>, vector<8x256xf32>, vector<8x256xf32> -> vector<72x256xf32>
    %cst_96 = arith.constant dense<0.000000e+00> : vector<2x256xf32>
    %350 = tpu.matmul %313, %349, %cst_96 {dimension_numbers = #tpu.dot_dimension_numbers<[1], [0], [0], [1], [0, 0, 1, 1], [], []>} : vector<2x72xf32>, vector<72x256xf32>, vector<2x256xf32> -> vector<2x256xf32>
    %351 = vector.broadcast %311 : vector<2x1xf32> to vector<2x256xf32>
    %352 = arith.addf %350, %351 : vector<2x256xf32>
    %353 = arith.addf %352, %312 : vector<2x256xf32>
    %c0_97 = arith.constant 0 : index
    %c0_98 = arith.constant 0 : index
    %c0_99 = arith.constant 0 : index
    %354 = vector.load %arg11[%c0_97, %c0_98, %c0_99] : memref<1x2x256xf32, #tpu.memory_space<vmem>>, vector<1x2x256xf32>
    %355 = vector.shape_cast %354 : vector<1x2x256xf32> to vector<2x256xf32>
    %356 = vector.shape_cast %353 : vector<2x256xf32> to vector<1x2x256xf32>
    tpu.vector_store %arg11[%c0_97, %c0_98, %c0_99], %356 {strides = array<i32>} : memref<1x2x256xf32, #tpu.memory_space<vmem>>, vector<1x2x256xf32>,
    return
  }
  func.func @transform_0(%arg0: i32) -> (i32, i32, i32) {
    %c0_i32 = arith.constant 0 : i32
    %c0_i32_0 = arith.constant 0 : i32
    %c0_i32_1 = arith.constant 0 : i32
    return %arg0, %c0_i32, %c0_i32_0 : i32, i32, i32
  }
  func.func @transform_1(%arg0: i32) -> (i32, i32) {
    %c0_i32 = arith.constant 0 : i32
    %c0_i32_0 = arith.constant 0 : i32
    %c0_i32_1 = arith.constant 0 : i32
    return %c0_i32, %c0_i32_0 : i32, i32
  }
  func.func @transform_2(%arg0: i32) -> (i32, i32) {
    %c0_i32 = arith.constant 0 : i32
    %c0_i32_0 = arith.constant 0 : i32
    %c0_i32_1 = arith.constant 0 : i32
    return %c0_i32, %c0_i32_0 : i32, i32
  }
  func.func @transform_3(%arg0: i32) -> (i32, i32) {
    %c0_i32 = arith.constant 0 : i32
    %c0_i32_0 = arith.constant 0 : i32
    %c0_i32_1 = arith.constant 0 : i32
    return %c0_i32, %c0_i32_0 : i32, i32
  }
  func.func @transform_4(%arg0: i32) -> (i32, i32) {
    %c0_i32 = arith.constant 0 : i32
    %c0_i32_0 = arith.constant 0 : i32
    %c0_i32_1 = arith.constant 0 : i32
    return %c0_i32, %c0_i32_0 : i32, i32
  }
  func.func @transform_5(%arg0: i32) -> (i32, i32) {
    %c0_i32 = arith.constant 0 : i32
    %c0_i32_0 = arith.constant 0 : i32
    %c0_i32_1 = arith.constant 0 : i32
    return %c0_i32, %c0_i32_0 : i32, i32
  }
  func.func @transform_6(%arg0: i32) -> (i32, i32) {
    %c0_i32 = arith.constant 0 : i32
    %c0_i32_0 = arith.constant 0 : i32
    %c0_i32_1 = arith.constant 0 : i32
    return %c0_i32, %c0_i32_0 : i32, i32
  }
  func.func @transform_7(%arg0: i32) -> (i32, i32) {
    %c0_i32 = arith.constant 0 : i32
    %c0_i32_0 = arith.constant 0 : i32
    %c0_i32_1 = arith.constant 0 : i32
    return %c0_i32, %c0_i32_0 : i32, i32
  }
  func.func @transform_8(%arg0: i32) -> (i32, i32) {
    %c0_i32 = arith.constant 0 : i32
    %c0_i32_0 = arith.constant 0 : i32
    %c0_i32_1 = arith.constant 0 : i32
    return %c0_i32, %c0_i32_0 : i32, i32
  }
  func.func @transform_9(%arg0: i32) -> (i32, i32) {
    %c0_i32 = arith.constant 0 : i32
    %c0_i32_0 = arith.constant 0 : i32
    %c0_i32_1 = arith.constant 0 : i32
    return %c0_i32, %c0_i32_0 : i32, i32
  }
  func.func @transform_10(%arg0: i32) -> (i32, i32, i32) {
    %c0_i32 = arith.constant 0 : i32
    %c0_i32_0 = arith.constant 0 : i32
    %c0_i32_1 = arith.constant 0 : i32
    return %arg0, %c0_i32, %c0_i32_0 : i32, i32, i32
  }
}

</mosaic_0001>

<bundles_post_ra>
// kernel: features2reco_forward.1
= control target key start
LH: loop header
LB: loop body
LE: loop exit
PB: predicated region body
PF: predicated region fallthrough
CT: control target
= control target key end

     0   :  { %s2189_s13 = smov 0   ;;  %s2806_s0 = inlined_call_operand.vmem [shape: f32[2,8,256], index: 0, kind: input, shape index: {}]   ;;  %s2807_s1 = inlined_call_operand.vmem [shape: f32[8,72], index: 1, kind: input, shape index: {}]   ;;  %s2808_s2 = inlined_call_operand.vmem [shape: f32[8,8], index: 2, kind: input, shape index: {}]   ;;  %s2809_s3 = inlined_call_operand.vmem [shape: f32[8,1], index: 3, kind: input, shape index: {}]   ;;  %s2810_s4 = inlined_call_operand.vmem [shape: f32[8,72], index: 4, kind: input, shape index: {}]   ;;  %s2811_s5 = inlined_call_operand.vmem [shape: f32[8,72], index: 5, kind: input, shape index: {}]   ;;  %s2812_s6 = inlined_call_operand.vmem [shape: f32[8,72], index: 6, kind: input, shape index: {}]   ;;  %s2813_s7 = inlined_call_operand.vmem [shape: f32[8,144], index: 7, kind: input, shape index: {}]   ;;  %s2814_s8 = inlined_call_operand.vmem [shape: f32[2,72], index: 8, kind: input, shape index: {}]   ;;  %s2815_s9 = inlined_call_operand.vmem [shape: f32[2,1], index: 9, kind: input, shape index: {}]   ;;  %s2816_s10 = inlined_call_operand.vmem [shape: f32[2,2,256], index: 10, kind: output, shape index: {}]  }
   0x1 LB: > { %s1597_s14 = sadd.s32 4294967295, %s2121_s13   ;;  %p1601_p0 = scmp.ge.s32.totalorder %s2121_s13, 1  ;;  %s2121_s13 = sphi %s2189_s13, %s20_s13  }
   0x2   : > { %p312_p1 = scmp.lt.s32.totalorder %s2121_s13, 3 }
   0x4   : > { %p313_p2 = pnand %p1601_p0, %p312_p1 }
   0x5   : > { %p350_p3 = scmp.lt.s32.totalorder (!%p313_p2), %s1597_s14, 1  ;;  %v2123_v0 = vmov (!%p313_p2), 0.0   ;;  %s2124_s15 = smov (!%p313_p2), 17   ;;  %v360_v5 = vlaneseq (!%p313_p2)  ;;  %vm2823_vm0 = vcmask (!%p313_p2), 138240   ;;  %vm2821_vm2 = vcmask (!%p313_p2), 130048  }
   0x6   : > { %316 = sbr.rel (%p313_p2) target bundleno = 3012 (0xbc4), region = 60  ;;  %401 = vrot.lane.b32.xlu1 (!%p313_p2), %v2123_v0, %s2124_s15  ;;  %573 = vmatprep.mubr.f32.mxu0 (!%p313_p2), %v2123_v0  ;;  %s2125_s20 = smov (!%p313_p2), 16   ;;  %vm2817_vm4 = vcmask (!%p313_p2), 7168   ;;  %vm2132_vm5 = vmmov (!%p313_p2), 1   ;;  %vm2818_vm7 = vcmask (!%p313_p2), 121856   ;;  %vm450_vm13 = vcmask (!%p313_p2), 1039360  }
   0x7   : > { %673 = vmatprep.mubr.f32.mxu1 (!%p313_p2), %v2123_v0  ;;  %s2126_s21 = smov (!%p313_p2), 1   ;;  %s2127_s22 = smov (!%p313_p2), 15   ;;  %v361_v7 = vand.u32 (!%p313_p2), 127, %v360_v5  ;;  %vm2819_vm14 = vcmask (!%p313_p2), 916480  }
   0x8   : > { %s2128_s23 = smov (!%p313_p2), 127   ;;  %s2129_s24 = smov (!%p313_p2), 112  }
   0x9   : > { %s2130_s25 = smov (!%p313_p2), 113   ;;  %s2131_s26 = smov (!%p313_p2), 111   ;;  %v362_v9 = vadd.s32 (!%p313_p2), 128, %v361_v7  ;;  %v367_v13 = vand.u32 (!%p313_p2), 15, %v361_v7 }
   0xa   : > { %483 = vrot.lane.b32.xlu1 (!%p313_p2), %v2123_v0, %s2125_s20 }
   0xb   : > { %v374_v12 = vand.u32 (!%p313_p2), 15, %v362_v9  ;;  %vm2250_vm3 = vcmp.ge.s32.totalorder (!%p313_p2), %v367_v13, 1  ;;  %vm2283_vm10 = vcmp.le.s32.totalorder (!%p313_p2), %v367_v13, 14  ;;  %v393_v13 = vld [vmem:[%s2807_s1] sm:$0xff] (!%p313_p2) }
   0xc   : > { %vm2272_vm8 = vmpackc.low (!%p313_p2), %vm2132_vm5, %vm2250_vm3 }
   0xd   : > { %s2919_s14 = smov (!%p350_p3, %s1597_s14), 1  ;;  %vm2246_vm1 = vcmp.ge.s32.totalorder %v374_v12, 1  ;;  %vm2276_vm9 = vcmp.le.s32.totalorder %v374_v12, 14  ;;  %vm2308_vm12 = vmpackc.low %vm2250_vm3, %vm2283_vm10 }
   0xe   : > { %s1700_s16 = sshll.u32 %s2919_s14, 4  ;;  %vm2261_vm6 = vmpackc.low %vm2132_vm5, %vm2246_vm1 }
   0xf   : > { %s354_s19 = scalar_lea.vmem %s2806_s0, %s1700_s16  ;;  %vm2294_vm11 = vmpackc.low %vm2246_vm1, %vm2276_vm9 }
  0x10   : > { %v2209_v1 = vld [vmem:[%s354_s19] sm:$0xff]  ;;  %v2211_v2 = vld [vmem:[%s354_s19 + $0x8] sm:$0xff]  ;;  %vm2326_vm15 = vmpackc.low %vm2276_vm9, %vm2132_vm5 }
  0x11   : > { %v1889_v3 = vpack.i.bf16 %v2211_v2, %v2209_v1  ;;  %609 = vmatprep.subr.mxu1 %v2211_v2  ;;  %v1919_v4 = vpack.i.bf16 %v2123_v0, %v2211_v2 }
  0x12   : > { %610 = vmatpush1.msra.mxu1 %v2209_v1 }
  0x13   : > { %1890 = vrot.lane.b32.xlu0 %v1889_v3, %s2124_s15  ;;  %1905 = vrot.lane.b32.xlu1 %v1889_v3, %s2126_s21 }
  0x17   : > { %1895 = vrot.lane.b32.xlu0 %v1889_v3, %s2125_s20  ;;  %431 = vrot.lane.b32.xlu1 %v2123_v0, %s2126_s21 }
  0x1b   : > { %1900 = vrot.lane.b32.xlu0 %v1889_v3, %s2127_s22  ;;  %444 = vrot.lane.b32.xlu1 %v2209_v1, %s2128_s23 }
  0x1f   : > { %418 = vrot.lane.b32.xlu0 %v2123_v0, %s2127_s22  ;;  %1920 = vrot.lane.b32.xlu1 %v1919_v4, %s2129_s24 }
  0x23   : > { %1910 = vrot.lane.b32.xlu0 %v1919_v4, %s2128_s23  ;;  %494 = vrot.lane.b32.xlu1 %v2209_v1, %s2129_s24 }
  0x27   : > { %1915 = vrot.lane.b32.xlu0 %v1919_v4, %s2130_s25  ;;  %474 = vrot.lane.b32.xlu1 %v2123_v0, %s2131_s26 }
  0x2b   : > { %457 = vrot.lane.b32.xlu0 %v2209_v1, %s2130_s25 }
  0x2f   : > { %472 = vrot.lane.b32.xlu0 %v2211_v2, %s2131_s26 }
  0x33   : > { %470 = vrot.lane.b32.xlu0 %v2209_v1, %s2131_s26 }
  0x78   : > { %v2242_v6 = vpop.permute.xlu1 %401 }
  0x7c   : > { %v2244_v8 = vpop.permute.xlu1 %483 }
  0x85   : > { %v1891_v10 = vpop.permute.xlu0 %1890  ;;  %v1906_v11 = vpop.permute.xlu1 %1905 }
  0x86   : > { %v1893_v14 = vunpack.i.h.bf16 %v1891_v10  ;;  %v1892_v15 = vunpack.i.l.bf16 %v1891_v10  ;;  %v1908_v22 = vunpack.i.h.bf16 %v1906_v11  ;;  %v1907_v23 = vunpack.i.l.bf16 %v1906_v11 }
  0x88   : > { %v409_v24 = vsel %vm2823_vm0, %v1892_v15, %v1893_v14  ;;  %v408_v27 = vsel %vm2823_vm0, %v2242_v6, %v1892_v15  ;;  %v439_v35 = vsel %vm2817_vm4, %v1907_v23, %v1908_v22 }
  0x89   : > { %v1896_v16 = vpop.permute.xlu0 %1895  ;;  %v2254_v19 = vpop.permute.xlu1 %431 }
  0x8a   : > { %v1898_v20 = vunpack.i.h.bf16 %v1896_v16  ;;  %v1897_v21 = vunpack.i.l.bf16 %v1896_v16  ;;  %v438_v41 = vsel %vm2817_vm4, %v2254_v19, %v1907_v23  ;;  %vm2824_vm4 = vcmask 924672  }
  0x8c   : > { %v491_v25 = vsel %vm2821_vm2, %v1897_v21, %v1898_v20  ;;  %v490_v28 = vsel %vm2821_vm2, %v2244_v8, %v1897_v21 }
  0x8d   : > { %v1901_v29 = vpop.permute.xlu0 %1900  ;;  %v1702_v30 = vpack.c.bf16 %v491_v25, %v409_v24  ;;  %v1705_v31 = vpack.c.bf16 %v490_v28, %v408_v27  ;;  %v445_v34 = vpop.permute.xlu1 %444 }
  0x8e   : > { %v1903_v36 = vunpack.i.h.bf16 %v1901_v29  ;;  %v1902_v37 = vunpack.i.l.bf16 %v1901_v29 }
  0x8f   : > { %1704 = vmatprep.subr.msk.bf16.mxu0 %vm2261_vm6, %v1702_v30 }
  0x90   : > { %v426_v39 = vsel %vm2818_vm7, %v1902_v37, %v1903_v36  ;;  %1707 = vmatpush1.bf16.msk.msra.mxu0 %vm2272_vm8, %v1705_v31 }
  0x91   : > { %v1708_v42 = vpack.c.bf16 %v439_v35, %v426_v39  ;;  %v2300_v43 = vpop.permute.xlu0 %418  ;;  %v1921_v47 = vpop.permute.xlu1 %1920 }
  0x92   : > { %v425_v44 = vsel %vm2818_vm7, %v2300_v43, %v1902_v37  ;;  %v2318_v51 = vunpack.i.h.bf16 %v1921_v47  ;;  %v1922_v52 = vunpack.i.l.bf16 %v1921_v47  ;;  %vm2335_vm7 = vmpackc.low %vm2283_vm10, %vm2132_vm5  ;;  %vm2822_vm5 = vcmask 908288  }
  0x93   : > { %1710 = vmatprep.subr.msk.bf16.mxu0 %vm2294_vm11, %v1708_v42  ;;  %v1711_v46 = vpack.c.bf16 %v438_v41, %v425_v44 }
  0x94   : > { %v502_v61 = vsel %vm2819_vm14, %v1922_v52, %v2318_v51 }
  0x95   : > { %v1911_v48 = vpop.permute.xlu0 %1910  ;;  %1713 = vmatpush1.bf16.msk.msra.mxu0 %vm2308_vm12, %v1711_v46  ;;  %v495_v60 = vpop.permute.xlu1 %494 }
  0x96   : > { %v2316_v49 = vunpack.i.h.bf16 %v1911_v48  ;;  %v1912_v50 = vunpack.i.l.bf16 %v1911_v48 }
  0x98   : > { %v451_v53 = vsel %vm450_vm13, %v445_v34, %v1912_v50  ;;  %v452_v54 = vsel %vm450_vm13, %v1912_v50, %v2316_v49  ;;  %v598_v34 = vld [vmem:[%s2808_s2] sm:$0xff] }
  0x99   : > { %v1714_v56 = vpack.c.bf16 %v452_v54, %v2211_v2  ;;  %v1717_v57 = vpack.c.bf16 %v451_v53, %v2209_v1  ;;  %v1916_v58 = vpop.permute.xlu0 %1915  ;;  %v501_v2 = vsel %vm2819_vm14, %v495_v60, %v1922_v52  ;;  %v2353_v9 = vpop.permute.xlu1 %474  ;;  %vm2820_vm14 = vcmask 588800  }
  0x9a   : > { %v2341_v62 = vunpack.i.h.bf16 %v1916_v58  ;;  %v1917_v63 = vunpack.i.l.bf16 %v1916_v58 }
  0x9b   : > { %1716 = vmatprep.subr.msk.bf16.mxu0 %vm2326_vm15, %v1714_v56 }
  0x9c   : > { %v465_v1 = vsel %vm2824_vm4, %v1917_v63, %v2341_v62  ;;  %1719 = vmatpush1.bf16.msk.msra.mxu0 %vm2335_vm7, %v1717_v57 }
  0x9d   : > { %v1720_v3 = vpack.c.bf16 %v502_v61, %v465_v1  ;;  %v458_v4 = vpop.permute.xlu0 %457 }
  0x9e   : > { %v464_v5 = vsel %vm2824_vm4, %v458_v4, %v1917_v63 }
  0x9f   : > { %v1723_v7 = vpack.c.bf16 %v501_v2, %v464_v5  ;;  %1722 = vmatprep.subr.msk.bf16.mxu0 %vm2261_vm6, %v1720_v3 }
  0xa1   : > { %v473_v10 = vpop.permute.xlu0 %472  ;;  %1725 = vmatpush1.bf16.msk.msra.mxu0 %vm2272_vm8, %v1723_v7 }
  0xa2   : > { %v478_v11 = vsel %vm2822_vm5, %v473_v10, %v2353_v9 }
  0xa3   : > { %1616 = vmatprep.subr.msk.mxu0 %vm2276_vm9, %v478_v11 }
  0xa5   : > { %v471_v12 = vpop.permute.xlu0 %470 }
  0xa6   : > { %v477_v14 = vsel %vm2822_vm5, %v471_v12, %v473_v10  ;;  %vm2847_vm5 = vcmask 7168  }
  0xa7   : > { %1617 = vmatpush1.msk.msra.mxu0 %vm2283_vm10, %v477_v14 }
  0xa8   : > { %1618 = vmatmul.mubr.msk.f32.vlgmr.msra.gmra.mrb[0].mxu0 %vm2820_vm14, %v393_v13  ;;  %vm605_vm14 = vcmask 64512  }
  0xa9   : > { %999 = vmatprep.mubr.f32.mxu0 %v2123_v0  ;;  %1619 = vmatmul.mubr.msk.f32.vlgmr.msra.gmra.mrb[0].mxu1 %vm605_vm14, %v598_v34  ;;  %vm2845_vm14 = vcmask 121856  }
  0xaa   : > { %826 = vmatprep.mubr.f32.mxu1 %v2123_v0 }
 0x17b   : > { %v575_v15 = vpop.f32.mrb[0].mxu0 }
 0x17c   : > { %v577_v16 = vpop.f32.mrb[1].mxu0  ;;  %v584_v20 = vmul.f32 %v575_v15, %v575_v15 }
 0x17d   : > { %v580_v21 = vadd.f32 %v577_v16, %v575_v15  ;;  %v585_v22 = vmul.f32 %v577_v16, %v577_v16 }
 0x17f   : > { %581 = vadd.xlane.f32.xlu1 %v580_v21  ;;  %v586_v23 = vadd.f32 %v585_v22, %v584_v20 }
 0x181   : > { %587 = vadd.xlane.f32.xlu0 %v586_v23 }
 0x20c   : > { %v582_v24 = vpop.xlane.xlu1 %581 }
 0x20d   : > { %v583_v25 = vmul.f32 0.00390625, %v582_v24 }
 0x20e   : > { %v588_v27 = vpop.xlane.xlu0 %587 }
 0x20f   : > { %v589_v28 = vmul.f32 0.00390625, %v588_v27  ;;  %v592_v29 = vmul.f32 %v583_v25, %v583_v25  ;;  %v590_v35 = vsub.f32 %v575_v15, %v583_v25  ;;  %v591_v36 = vsub.f32 %v577_v16, %v583_v25 }
 0x211   : > { %v593_v30 = vsub.f32 %v589_v28, %v592_v29 }
 0x213   : > { %v594_v31 = vadd.f32 1e-05, %v593_v30 }
 0x215   : > { %2105 = vrsqrt.f32 %v594_v31 }
 0x21f   : > { %v2106_v37 = vpop.eup %2105 }
 0x220   : > { %v596_v39 = vmul.f32 %v2106_v37, %v590_v35  ;;  %v597_v41 = vmul.f32 %v2106_v37, %v591_v36 }
 0x222   : > { %v1929_v42 = vpack.i.bf16 %v597_v41, %v596_v39  ;;  %v1944_v44 = vpack.i.bf16 %v596_v39, %v597_v41 }
 0x224   : > { %1930 = vrot.lane.b32.xlu1 %v1929_v42, %s2125_s20  ;;  %1925 = vrot.lane.b32.xlu0 %v1929_v42, %s2124_s15 }
 0x228   : > { %1935 = vrot.lane.b32.xlu1 %v1929_v42, %s2127_s22  ;;  %1940 = vrot.lane.b32.xlu0 %v1929_v42, %s2126_s21 }
 0x22c   : > { %1945 = vrot.lane.b32.xlu1 %v1944_v44, %s2128_s23  ;;  %1950 = vrot.lane.b32.xlu0 %v1944_v44, %s2130_s25 }
 0x230   : > { %1955 = vrot.lane.b32.xlu1 %v1944_v44, %s2129_s24  ;;  %735 = vrot.lane.b32.xlu0 %v597_v41, %s2131_s26 }
 0x234   : > { %733 = vrot.lane.b32.xlu1 %v596_v39, %s2131_s26 }
 0x296   : > { %v1931_v46 = vpop.permute.xlu1 %1930  ;;  %v1926_v47 = vpop.permute.xlu0 %1925 }
 0x297   : > { %v1933_v48 = vunpack.i.h.bf16 %v1931_v46  ;;  %v1932_v50 = vunpack.i.l.bf16 %v1931_v46  ;;  %v1928_v52 = vunpack.i.h.bf16 %v1926_v47  ;;  %v1927_v53 = vunpack.i.l.bf16 %v1926_v47  ;;  %v680_v47 = vld [vmem:[%s2810_s4] sm:$0xff] }
 0x299   : > { %v747_v54 = vsel %vm2821_vm2, %v2244_v8, %v1932_v50  ;;  %v748_v56 = vsel %vm2821_vm2, %v1932_v50, %v1933_v48  ;;  %v687_v57 = vsel %vm2823_vm0, %v2242_v6, %v1927_v53  ;;  %v688_v58 = vsel %vm2823_vm0, %v1927_v53, %v1928_v52  ;;  %vm2846_vm2 = vmmov %vm2845_vm14  ;;  %v675_v50 = vpop.f32.mrb[0].mxu1 }
 0x29a   : > { %v1726_v60 = vpack.c.bf16 %v748_v56, %v688_v58  ;;  %v1729_v61 = vpack.c.bf16 %v747_v54, %v687_v57  ;;  %v1936_v63 = vpop.permute.xlu1 %1935  ;;  %v1941_v1 = vpop.permute.xlu0 %1940  ;;  %vm2848_vm0 = vmmov %vm2847_vm5  ;;  %v2133_v53 = vmov 0  }
 0x29b   : > { %v1938_v2 = vunpack.i.h.bf16 %v1936_v63  ;;  %v1937_v3 = vunpack.i.l.bf16 %v1936_v63  ;;  %v1943_v4 = vunpack.i.h.bf16 %v1941_v1  ;;  %v1942_v5 = vunpack.i.l.bf16 %v1941_v1  ;;  %v677_v52 = vpop.f32.mrb[1].mxu1  ;;  %1959 = vset.pattern.permute.xlu0 %v2133_v53  ;;  %v599_v63 = vld [vmem:[%s2809_s3] sm:$0xff] }
 0x29c   : > { %1728 = vmatprep.subr.msk.bf16.mxu1 %vm2261_vm6, %v1726_v60 }
 0x29d   : > { %v697_v7 = vsel %vm2845_vm14, %v2300_v43, %v1937_v3  ;;  %v698_v10 = vsel %vm2846_vm2, %v1937_v3, %v1938_v2  ;;  %v707_v11 = vsel %vm2847_vm5, %v2254_v19, %v1942_v5  ;;  %v708_v12 = vsel %vm2848_vm0, %v1942_v5, %v1943_v4  ;;  %1731 = vmatpush1.bf16.msk.msra.mxu1 %vm2272_vm8, %v1729_v61 }
 0x29e   : > { %v1732_v13 = vpack.c.bf16 %v708_v12, %v698_v10  ;;  %v1735_v14 = vpack.c.bf16 %v707_v11, %v697_v7  ;;  %v1946_v15 = vpop.permute.xlu1 %1945  ;;  %v1951_v16 = vpop.permute.xlu0 %1950  ;;  %vm2849_vm0 = vcmask 916480   ;;  %vm2851_vm5 = vcmask 908288  }
 0x29f   : > { %v1948_v20 = vunpack.i.h.bf16 %v1946_v15  ;;  %v1947_v21 = vunpack.i.l.bf16 %v1946_v15  ;;  %v1953_v24 = vunpack.i.h.bf16 %v1951_v16  ;;  %v1952_v25 = vunpack.i.l.bf16 %v1951_v16  ;;  %vm2850_vm2 = vmmov %vm2849_vm0 }
 0x2a0   : > { %1734 = vmatprep.subr.msk.bf16.mxu1 %vm2294_vm11, %v1732_v13  ;;  %vm2852_vm14 = vmmov %vm2851_vm5 }
 0x2a1   : > { %v717_v22 = vsel %vm450_vm13, %v1948_v20, %v1947_v21  ;;  %v718_v23 = vsel %vm450_vm13, %v1947_v21, %v2316_v49  ;;  %1737 = vmatpush1.bf16.msk.msra.mxu1 %vm2308_vm12, %v1735_v14  ;;  %v727_v34 = vsel %vm2824_vm4, %v1953_v24, %v1952_v25  ;;  %v728_v35 = vsel %vm2824_vm4, %v1952_v25, %v2341_v62 }
 0x2a2   : > { %v1738_v27 = vpack.c.bf16 %v718_v23, %v597_v41  ;;  %v1741_v28 = vpack.c.bf16 %v717_v22, %v596_v39  ;;  %v1956_v29 = vpop.permute.xlu1 %1955  ;;  %v736_v42 = vpop.permute.xlu0 %735 }
 0x2a3   : > { %v1958_v30 = vunpack.i.h.bf16 %v1956_v29  ;;  %v1957_v31 = vunpack.i.l.bf16 %v1956_v29  ;;  %v738_v44 = vsel %vm2851_vm5, %v736_v42, %v2353_v9 }
 0x2a4   : > { %1740 = vmatprep.subr.msk.bf16.mxu1 %vm2326_vm15, %v1738_v27 }
 0x2a5   : > { %v755_v36 = vsel %vm2849_vm0, %v1958_v30, %v1957_v31  ;;  %v756_v37 = vsel %vm2850_vm2, %v1957_v31, %v2318_v51  ;;  %1743 = vmatpush1.bf16.msk.msra.mxu1 %vm2335_vm7, %v1741_v28  ;;  %vm2853_vm0 = vcmask 588800   ;;  %vm2854_vm2 = vcmask 138240  }
 0x2a6   : > { %v1744_v39 = vpack.c.bf16 %v756_v37, %v728_v35  ;;  %v1747_v41 = vpack.c.bf16 %v755_v36, %v727_v34  ;;  %v734_v46 = vpop.permute.xlu1 %733  ;;  %vm2855_vm5 = vmmov %vm2854_vm2 }
 0x2a7   : > { %v737_v48 = vsel %vm2852_vm14, %v734_v46, %v736_v42  ;;  %vm2856_vm14 = vcmask 130048  }
 0x2a8   : > { %1746 = vmatprep.subr.msk.bf16.mxu1 %vm2261_vm6, %v1744_v39 }
 0x2a9   : > { %1749 = vmatpush1.bf16.msk.msra.mxu1 %vm2272_vm8, %v1747_v41 }
 0x2aa   : > { %1630 = vmatprep.subr.msk.mxu1 %vm2276_vm9, %v738_v44 }
 0x2ad   : > { %1631 = vmatpush1.msk.msra.mxu1 %vm2283_vm10, %v737_v48 }
 0x2ae   : > { %1632 = vmatmul.mubr.msk.f32.vlgmr.msra.gmra.mrb[2].mxu1 %vm2853_vm0, %v680_v47  ;;  %vm2857_vm0 = vmmov %vm2856_vm14 }
 0x2af   : > { %1170 = vmatprep.mubr.f32.mxu1 %v2123_v0 }
 0x381   : > { %v828_v54 = vpop.f32.mrb[2].mxu1 }
 0x382   : > { %v830_v56 = vpop.f32.mrb[3].mxu1  ;;  %v837_v57 = vmul.f32 %v828_v54, %v828_v54 }
 0x383   : > { %v833_v58 = vadd.f32 %v830_v56, %v828_v54  ;;  %v838_v60 = vmul.f32 %v830_v56, %v830_v56 }
 0x385   : > { %834 = vadd.xlane.f32.xlu0 %v833_v58  ;;  %v839_v61 = vadd.f32 %v838_v60, %v837_v57 }
 0x387   : > { %840 = vadd.xlane.f32.xlu1 %v839_v61 }
 0x39b   : > { %602 = vperm.xlu0 %1959, %v599_v63  }
 0x412   : > { %v835_v1 = vpop.xlane.xlu0 %834 }
 0x413   : > { %v836_v2 = vmul.f32 0.00390625, %v835_v1 }
 0x414   : > { %v841_v3 = vpop.xlane.xlu1 %840 }
 0x415   : > { %v842_v4 = vmul.f32 0.00390625, %v841_v3  ;;  %v845_v5 = vmul.f32 %v836_v2, %v836_v2  ;;  %v843_v12 = vsub.f32 %v828_v54, %v836_v2  ;;  %v844_v13 = vsub.f32 %v830_v56, %v836_v2 }
 0x417   : > { %v846_v7 = vsub.f32 %v842_v4, %v845_v5 }
 0x419   : > { %v847_v10 = vadd.f32 1e-05, %v846_v7 }
 0x41a   : > { %v603_v11 = vpop.permute.xlu0 %602 }
 0x41b   : > { %2107 = vrsqrt.f32 %v847_v10  ;;  %v676_v20 = vadd.f32 %v675_v50, %v603_v11  ;;  %v678_v21 = vadd.f32 %v677_v52, %v603_v11 }
 0x425   : > { %v2108_v14 = vpop.eup %2107 }
 0x426   : > { %v849_v15 = vmul.f32 %v2108_v14, %v843_v12  ;;  %v850_v16 = vmul.f32 %v2108_v14, %v844_v13 }
 0x428   : > { %v2434_v22 = vadd.f32 %v849_v15, %v676_v20  ;;  %v2436_v23 = vadd.f32 %v850_v16, %v678_v21 }
 0x42a   : > { %908 = vrot.lane.b32.xlu0 %v2436_v23, %s2131_s26  ;;  %v1960_v24 = vpack.i.bf16 %v2436_v23, %v2434_v22  ;;  %v1980_v25 = vpack.i.bf16 %v2434_v22, %v2436_v23 }
 0x42c   : > { %1961 = vrot.lane.b32.xlu1 %v1960_v24, %s2124_s15 }
 0x430   : > { %1966 = vrot.lane.b32.xlu1 %v1960_v24, %s2125_s20 }
 0x434   : > { %1971 = vrot.lane.b32.xlu1 %v1960_v24, %s2127_s22 }
 0x438   : > { %1976 = vrot.lane.b32.xlu1 %v1960_v24, %s2126_s21 }
 0x43c   : > { %1981 = vrot.lane.b32.xlu1 %v1980_v25, %s2128_s23 }
 0x440   : > { %1986 = vrot.lane.b32.xlu1 %v1980_v25, %s2130_s25 }
 0x444   : > { %1991 = vrot.lane.b32.xlu1 %v1980_v25, %s2129_s24 }
 0x448   : > { %906 = vrot.lane.b32.xlu1 %v2434_v22, %s2131_s26 }
 0x49c   : > { %v909_v24 = vpop.permute.xlu0 %908 }
 0x49e   : > { %v1962_v27 = vpop.permute.xlu1 %1961 }
 0x49f   : > { %v1964_v28 = vunpack.i.h.bf16 %v1962_v27  ;;  %v1963_v29 = vunpack.i.l.bf16 %v1962_v27 }
 0x4a1   : > { %v2455_v35 = vsel %vm2854_vm2, %v2242_v6, %v1963_v29  ;;  %v2458_v36 = vsel %vm2855_vm5, %v1963_v29, %v1964_v28  ;;  %vm2858_vm2 = vcmask 121856  }
 0x4a2   : > { %v1967_v30 = vpop.permute.xlu1 %1966  ;;  %vm2859_vm5 = vmmov %vm2858_vm2 }
 0x4a3   : > { %v1969_v31 = vunpack.i.h.bf16 %v1967_v30  ;;  %v1968_v34 = vunpack.i.l.bf16 %v1967_v30  ;;  %v853_v30 = vld [vmem:[%s2811_s5] sm:$0xff] }
 0x4a5   : > { %v2462_v37 = vsel %vm2856_vm14, %v2244_v8, %v1968_v34  ;;  %v2465_v39 = vsel %vm2857_vm0, %v1968_v34, %v1969_v31  ;;  %vm2860_vm14 = vcmask 7168  }
 0x4a6   : > { %v1750_v41 = vpack.c.bf16 %v2465_v39, %v2458_v36  ;;  %v1753_v42 = vpack.c.bf16 %v2462_v37, %v2455_v35  ;;  %v1972_v44 = vpop.permute.xlu1 %1971  ;;  %vm2861_vm0 = vmmov %vm2860_vm14 }
 0x4a7   : > { %v1974_v46 = vunpack.i.h.bf16 %v1972_v44  ;;  %v1973_v47 = vunpack.i.l.bf16 %v1972_v44 }
 0x4a8   : > { %1752 = vmatprep.subr.msk.bf16.mxu0 %vm2261_vm6, %v1750_v41 }
 0x4a9   : > { %1755 = vmatpush1.bf16.msk.msra.mxu0 %vm2272_vm8, %v1753_v42  ;;  %v2477_v53 = vsel %vm2858_vm2, %v2300_v43, %v1973_v47  ;;  %v2480_v54 = vsel %vm2859_vm5, %v1973_v47, %v1974_v46  ;;  %vm2862_vm2 = vcmask 916480  }
 0x4aa   : > { %v1977_v48 = vpop.permute.xlu1 %1976  ;;  %vm2863_vm5 = vmmov %vm2862_vm2 }
 0x4ab   : > { %v1979_v50 = vunpack.i.h.bf16 %v1977_v48  ;;  %v1978_v52 = vunpack.i.l.bf16 %v1977_v48 }
 0x4ad   : > { %v2484_v56 = vsel %vm2860_vm14, %v2254_v19, %v1978_v52  ;;  %v2487_v57 = vsel %vm2861_vm0, %v1978_v52, %v1979_v50  ;;  %vm2864_vm14 = vcmask 908288  }
 0x4ae   : > { %v1756_v58 = vpack.c.bf16 %v2487_v57, %v2480_v54  ;;  %v1759_v60 = vpack.c.bf16 %v2484_v56, %v2477_v53  ;;  %v1982_v61 = vpop.permute.xlu1 %1981  ;;  %v2534_v28 = vsel %vm2864_vm14, %v909_v24, %v2353_v9  ;;  %vm2865_vm0 = vmmov %vm2864_vm14 }
 0x4af   : > { %v1984_v63 = vunpack.i.h.bf16 %v1982_v61  ;;  %v1983_v1 = vunpack.i.l.bf16 %v1982_v61 }
 0x4b0   : > { %1758 = vmatprep.subr.msk.bf16.mxu0 %vm2294_vm11, %v1756_v58 }
 0x4b1   : > { %v2496_v2 = vsel %vm450_vm13, %v1984_v63, %v1983_v1  ;;  %v2500_v3 = vsel %vm450_vm13, %v1983_v1, %v2316_v49  ;;  %1761 = vmatpush1.bf16.msk.msra.mxu0 %vm2308_vm12, %v1759_v60 }
 0x4b2   : > { %v1762_v4 = vpack.c.bf16 %v2500_v3, %v2436_v23  ;;  %v1765_v5 = vpack.c.bf16 %v2496_v2, %v2434_v22  ;;  %v1987_v7 = vpop.permute.xlu1 %1986 }
 0x4b3   : > { %v1989_v10 = vunpack.i.h.bf16 %v1987_v7  ;;  %v1988_v11 = vunpack.i.l.bf16 %v1987_v7 }
 0x4b4   : > { %1764 = vmatprep.subr.msk.bf16.mxu0 %vm2326_vm15, %v1762_v4 }
 0x4b5   : > { %1767 = vmatpush1.bf16.msk.msra.mxu0 %vm2335_vm7, %v1765_v5  ;;  %v2513_v15 = vsel %vm2824_vm4, %v1989_v10, %v1988_v11  ;;  %v2517_v16 = vsel %vm2824_vm4, %v1988_v11, %v2341_v62 }
 0x4b6   : > { %v1992_v12 = vpop.permute.xlu1 %1991 }
 0x4b7   : > { %v1994_v13 = vunpack.i.h.bf16 %v1992_v12  ;;  %v1993_v14 = vunpack.i.l.bf16 %v1992_v12 }
 0x4b9   : > { %v2520_v20 = vsel %vm2862_vm2, %v1994_v13, %v1993_v14  ;;  %v2524_v21 = vsel %vm2863_vm5, %v1993_v14, %v2318_v51  ;;  %vm2866_vm2 = vcmask 588800   ;;  %vm2867_vm5 = vcmask 130048  }
 0x4ba   : > { %v1768_v25 = vpack.c.bf16 %v2524_v21, %v2517_v16  ;;  %v1771_v27 = vpack.c.bf16 %v2520_v20, %v2513_v15  ;;  %v907_v29 = vpop.permute.xlu1 %906  ;;  %vm2868_vm14 = vmmov %vm2867_vm5 }
 0x4bb   : > { %v2545_v31 = vsel %vm2865_vm0, %v907_v29, %v909_v24  ;;  %vm2869_vm0 = vcmask 138240  }
 0x4bc   : > { %1770 = vmatprep.subr.msk.bf16.mxu0 %vm2261_vm6, %v1768_v25 }
 0x4bd   : > { %1773 = vmatpush1.bf16.msk.msra.mxu0 %vm2272_vm8, %v1771_v27 }
 0x4be   : > { %1643 = vmatprep.subr.msk.mxu0 %vm2276_vm9, %v2534_v28 }
 0x4c1   : > { %1644 = vmatpush1.msk.msra.mxu0 %vm2283_vm10, %v2545_v31 }
 0x4c2   : > { %1645 = vmatmul.mubr.msk.f32.vlgmr.msra.gmra.mrb[2].mxu0 %vm2866_vm2, %v853_v30  ;;  %vm2870_vm2 = vmmov %vm2869_vm0 }
 0x595   : > { %v1001_v34 = vpop.f32.mrb[2].mxu0 }
 0x596   : > { %v1003_v41 = vpop.f32.mrb[3].mxu0  ;;  %v1010_v42 = vmul.f32 %v1001_v34, %v1001_v34 }
 0x597   : > { %v1006_v44 = vadd.f32 %v1003_v41, %v1001_v34  ;;  %v1011_v46 = vmul.f32 %v1003_v41, %v1003_v41 }
 0x599   : > { %1007 = vadd.xlane.f32.xlu0 %v1006_v44  ;;  %v1012_v47 = vadd.f32 %v1011_v46, %v1010_v42 }
 0x59b   : > { %1013 = vadd.xlane.f32.xlu1 %v1012_v47 }
 0x626   : > { %v1008_v48 = vpop.xlane.xlu0 %1007 }
 0x627   : > { %v1009_v50 = vmul.f32 0.00390625, %v1008_v48 }
 0x628   : > { %v1014_v52 = vpop.xlane.xlu1 %1013 }
 0x629   : > { %v1015_v58 = vmul.f32 0.00390625, %v1014_v52  ;;  %v1018_v60 = vmul.f32 %v1009_v50, %v1009_v50  ;;  %v1016_v1 = vsub.f32 %v1001_v34, %v1009_v50  ;;  %v1017_v4 = vsub.f32 %v1003_v41, %v1009_v50 }
 0x62b   : > { %v1019_v61 = vsub.f32 %v1015_v58, %v1018_v60 }
 0x62d   : > { %v1020_v63 = vadd.f32 1e-05, %v1019_v61 }
 0x62f   : > { %2109 = vrsqrt.f32 %v1020_v63 }
 0x639   : > { %v2110_v5 = vpop.eup %2109 }
 0x63a   : > { %v1022_v7 = vmul.f32 %v2110_v5, %v1016_v1  ;;  %v1023_v10 = vmul.f32 %v2110_v5, %v1017_v4 }
 0x63c   : > { %v2000_v11 = vpack.i.bf16 %v1023_v10, %v1022_v7  ;;  %v2020_v12 = vpack.i.bf16 %v1022_v7, %v1023_v10 }
 0x63e   : > { %2001 = vrot.lane.b32.xlu1 %v2000_v11, %s2125_s20  ;;  %1996 = vrot.lane.b32.xlu0 %v2000_v11, %s2124_s15 }
 0x642   : > { %2011 = vrot.lane.b32.xlu1 %v2000_v11, %s2126_s21  ;;  %2006 = vrot.lane.b32.xlu0 %v2000_v11, %s2127_s22 }
 0x646   : > { %2021 = vrot.lane.b32.xlu1 %v2020_v12, %s2130_s25  ;;  %2016 = vrot.lane.b32.xlu0 %v2020_v12, %s2128_s23 }
 0x64a   : > { %1079 = vrot.lane.b32.xlu1 %v1023_v10, %s2131_s26  ;;  %2026 = vrot.lane.b32.xlu0 %v2020_v12, %s2129_s24 }
 0x64e   : > { %1077 = vrot.lane.b32.xlu0 %v1022_v7, %s2131_s26 }
 0x6b0   : > { %v2002_v13 = vpop.permute.xlu1 %2001  ;;  %v1997_v14 = vpop.permute.xlu0 %1996 }
 0x6b1   : > { %v2004_v24 = vunpack.i.h.bf16 %v2002_v13  ;;  %v2003_v25 = vunpack.i.l.bf16 %v2002_v13  ;;  %v1999_v27 = vunpack.i.h.bf16 %v1997_v14  ;;  %v1998_v29 = vunpack.i.l.bf16 %v1997_v14 }
 0x6b3   : > { %v1091_v30 = vsel %vm2867_vm5, %v2244_v8, %v2003_v25  ;;  %v1092_v34 = vsel %vm2868_vm14, %v2003_v25, %v2004_v24  ;;  %v1031_v41 = vsel %vm2869_vm0, %v2242_v6, %v1998_v29  ;;  %v1032_v42 = vsel %vm2870_vm2, %v1998_v29, %v1999_v27 }
 0x6b4   : > { %v1774_v44 = vpack.c.bf16 %v1092_v34, %v1032_v42  ;;  %v1777_v46 = vpack.c.bf16 %v1091_v30, %v1031_v41  ;;  %v2012_v47 = vpop.permute.xlu1 %2011  ;;  %v2007_v48 = vpop.permute.xlu0 %2006  ;;  %vm2871_vm5 = vcmask 7168   ;;  %vm2873_vm0 = vcmask 121856  }
 0x6b5   : > { %v2014_v50 = vunpack.i.h.bf16 %v2012_v47  ;;  %v2013_v52 = vunpack.i.l.bf16 %v2012_v47  ;;  %v2009_v58 = vunpack.i.h.bf16 %v2007_v48  ;;  %v2008_v60 = vunpack.i.l.bf16 %v2007_v48  ;;  %vm2872_vm14 = vmmov %vm2871_vm5 }
 0x6b6   : > { %1776 = vmatprep.subr.msk.bf16.mxu1 %vm2261_vm6, %v1774_v44  ;;  %vm2874_vm2 = vmmov %vm2873_vm0 }
 0x6b7   : > { %v1051_v61 = vsel %vm2871_vm5, %v2254_v19, %v2013_v52  ;;  %v1052_v63 = vsel %vm2872_vm14, %v2013_v52, %v2014_v50  ;;  %v1041_v1 = vsel %vm2873_vm0, %v2300_v43, %v2008_v60  ;;  %v1042_v4 = vsel %vm2874_vm2, %v2008_v60, %v2009_v58  ;;  %1779 = vmatpush1.bf16.msk.msra.mxu1 %vm2272_vm8, %v1777_v46 }
 0x6b8   : > { %v1780_v5 = vpack.c.bf16 %v1052_v63, %v1042_v4  ;;  %v1783_v11 = vpack.c.bf16 %v1051_v61, %v1041_v1  ;;  %v2022_v12 = vpop.permute.xlu1 %2021  ;;  %v2017_v13 = vpop.permute.xlu0 %2016  ;;  %vm2875_vm5 = vcmask 916480   ;;  %vm2877_vm0 = vcmask 908288   ;;  %v1024_v63 = vld [vmem:[%s2812_s6] sm:$0xff] }
 0x6b9   : > { %v2019_v14 = vunpack.i.h.bf16 %v2017_v13  ;;  %v2018_v24 = vunpack.i.l.bf16 %v2017_v13  ;;  %v2024_v25 = vunpack.i.h.bf16 %v2022_v12  ;;  %v2023_v27 = vunpack.i.l.bf16 %v2022_v12  ;;  %vm2876_vm14 = vmmov %vm2875_vm5 }
 0x6ba   : > { %1782 = vmatprep.subr.msk.bf16.mxu1 %vm2294_vm11, %v1780_v5  ;;  %vm2878_vm2 = vmmov %vm2877_vm0 }
 0x6bb   : > { %v1061_v29 = vsel %vm450_vm13, %v2019_v14, %v2018_v24  ;;  %v1062_v30 = vsel %vm450_vm13, %v2018_v24, %v2316_v49  ;;  %1785 = vmatpush1.bf16.msk.msra.mxu1 %vm2308_vm12, %v1783_v11  ;;  %v1071_v47 = vsel %vm2824_vm4, %v2024_v25, %v2023_v27  ;;  %v1072_v48 = vsel %vm2824_vm4, %v2023_v27, %v2341_v62 }
 0x6bc   : > { %v1786_v34 = vpack.c.bf16 %v1062_v30, %v1023_v10  ;;  %v1789_v41 = vpack.c.bf16 %v1061_v29, %v1022_v7  ;;  %v2027_v42 = vpop.permute.xlu0 %2026  ;;  %v1080_v7 = vpop.permute.xlu1 %1079 }
 0x6bd   : > { %v2029_v44 = vunpack.i.h.bf16 %v2027_v42  ;;  %v2028_v46 = vunpack.i.l.bf16 %v2027_v42  ;;  %v1082_v60 = vsel %vm2877_vm0, %v1080_v7, %v2353_v9  ;;  %vm2881_vm0 = vcmask 138240  }
 0x6be   : > { %1788 = vmatprep.subr.msk.bf16.mxu1 %vm2326_vm15, %v1786_v34 }
 0x6bf   : > { %v1099_v50 = vsel %vm2875_vm5, %v2029_v44, %v2028_v46  ;;  %v1100_v52 = vsel %vm2876_vm14, %v2028_v46, %v2318_v51  ;;  %1791 = vmatpush1.bf16.msk.msra.mxu1 %vm2335_vm7, %v1789_v41  ;;  %vm2879_vm5 = vcmask 588800   ;;  %vm2880_vm14 = vcmask 130048  }
 0x6c0   : > { %v1792_v10 = vpack.c.bf16 %v1100_v52, %v1072_v48  ;;  %v1795_v58 = vpack.c.bf16 %v1099_v50, %v1071_v47  ;;  %v1078_v61 = vpop.permute.xlu0 %1077  ;;  %vm2885_vm4 = vmmov %vm2880_vm14 }
 0x6c1   : > { %v1081_v1 = vsel %vm2878_vm2, %v1078_v61, %v1080_v7  ;;  %vm2882_vm2 = vmmov %vm2881_vm0 }
 0x6c2   : > { %1794 = vmatprep.subr.msk.bf16.mxu1 %vm2261_vm6, %v1792_v10  ;;  %v1198_v10 = vld [vmem:[%s2813_s7 + $0x8] sm:$0xff] }
 0x6c3   : > { %1797 = vmatpush1.bf16.msk.msra.mxu1 %vm2272_vm8, %v1795_v58  ;;  %1683 = vmatprep.mubr.msk.f32.mxu0 %vm2880_vm14, %v1198_v10  ;;  %vm2643_vm14 = vmpackc.low %vm2250_vm3, %vm2250_vm3 }
 0x6c4   : > { %1656 = vmatprep.subr.msk.mxu1 %vm2276_vm9, %v1082_v60  ;;  %vm2659_vm3 = vmpackc.low %vm2276_vm9, %vm2276_vm9 }
 0x6c7   : > { %1657 = vmatpush1.msk.msra.mxu1 %vm2283_vm10, %v1081_v1 }
 0x6c8   : > { %1658 = vmatmul.mubr.msk.f32.vlgmr.msra.gmra.mrb[4].mxu1 %vm2879_vm5, %v1024_v63  ;;  %vm2633_vm5 = vmpackc.low %vm2246_vm1, %vm2246_vm1 }
 0x6c9   : > { %1521 = vmatprep.mubr.f32.mxu1 %v2123_v0  ;;  %vm2888_vm1 = vmmov %vm2885_vm4 }
 0x79b   : > { %v1172_v4 = vpop.f32.mrb[4].mxu1 }
 0x79c   : > { %v1174_v5 = vpop.f32.mrb[5].mxu1  ;;  %v1181_v11 = vmul.f32 %v1172_v4, %v1172_v4 }
 0x79d   : > { %v1177_v12 = vadd.f32 %v1174_v5, %v1172_v4  ;;  %v1182_v13 = vmul.f32 %v1174_v5, %v1174_v5 }
 0x79f   : > { %1178 = vadd.xlane.f32.xlu1 %v1177_v12  ;;  %v1183_v14 = vadd.f32 %v1182_v13, %v1181_v11 }
 0x7a1   : > { %1184 = vadd.xlane.f32.xlu0 %v1183_v14 }
 0x82c   : > { %v1179_v24 = vpop.xlane.xlu1 %1178 }
 0x82d   : > { %v1180_v25 = vmul.f32 0.00390625, %v1179_v24 }
 0x82e   : > { %v1185_v27 = vpop.xlane.xlu0 %1184 }
 0x82f   : > { %v1186_v29 = vmul.f32 0.00390625, %v1185_v27  ;;  %v1189_v30 = vmul.f32 %v1180_v25, %v1180_v25  ;;  %v1187_v42 = vsub.f32 %v1172_v4, %v1180_v25  ;;  %v1188_v44 = vsub.f32 %v1174_v5, %v1180_v25 }
 0x831   : > { %v1190_v34 = vsub.f32 %v1186_v29, %v1189_v30 }
 0x833   : > { %v1191_v41 = vadd.f32 1e-05, %v1190_v34 }
 0x835   : > { %2111 = vrsqrt.f32 %v1191_v41 }
 0x83f   : > { %v2112_v46 = vpop.eup %2111 }
 0x840   : > { %v1193_v0 = vmul.f32 %v2112_v46, %v1187_v42  ;;  %v1194_v47 = vmul.f32 %v2112_v46, %v1188_v44 }
 0x842   : > { %v2610_v48 = vadd.f32 %v1193_v0, %v2434_v22  ;;  %v1196_v50 = vadd.f32 %v1194_v47, %v2436_v23 }
 0x844   : > { %v2035_v52 = vpack.i.bf16 %v1196_v50, %v2610_v48  ;;  %v2050_v7 = vpack.i.bf16 %v2610_v48, %v1196_v50 }
 0x846   : > { %2036 = vrot.lane.b32.xlu1 %v2035_v52, %s2125_s20  ;;  %2031 = vrot.lane.b32.xlu0 %v2035_v52, %s2124_s15 }
 0x84a   : > { %2041 = vrot.lane.b32.xlu1 %v2035_v52, %s2127_s22  ;;  %2046 = vrot.lane.b32.xlu0 %v2035_v52, %s2126_s21 }
 0x84e   : > { %2051 = vrot.lane.b32.xlu1 %v2050_v7, %s2128_s23  ;;  %2056 = vrot.lane.b32.xlu0 %v2050_v7, %s2130_s25 }
 0x852   : > { %2061 = vrot.lane.b32.xlu1 %v2050_v7, %s2129_s24  ;;  %2066 = vrot.lane.b32.xlu0 %v2050_v7, %s2131_s26 }
 0x8b8   : > { %v2037_v58 = vpop.permute.xlu1 %2036  ;;  %v2032_v60 = vpop.permute.xlu0 %2031 }
 0x8b9   : > { %v2039_v61 = vunpack.i.h.bf16 %v2037_v58  ;;  %v2038_v63 = vunpack.i.l.bf16 %v2037_v58  ;;  %v2034_v1 = vunpack.i.h.bf16 %v2032_v60  ;;  %v2033_v4 = vunpack.i.l.bf16 %v2032_v60 }
 0x8bb   : > { %v1205_v5 = vsel %vm2881_vm0, %v2242_v6, %v2033_v4  ;;  %v1206_v11 = vsel %vm2882_vm2, %v2033_v4, %v2034_v1  ;;  %v1266_v13 = vsel %vm2885_vm4, %v2038_v63, %v2039_v61  ;;  %v1265_v34 = vsel %vm2888_vm1, %v2244_v8, %v2038_v63  ;;  %vm2672_vm1 = vmpackc.low %vm2283_vm10, %vm2283_vm10 }
 0x8bc   : > { %v1798_v14 = vpack.c.bf16 %v1206_v11, %v2458_v36  ;;  %v1801_v24 = vpack.c.bf16 %v1205_v5, %v2455_v35  ;;  %v2042_v25 = vpop.permute.xlu1 %2041  ;;  %v2047_v27 = vpop.permute.xlu0 %2046  ;;  %v1804_v36 = vpack.c.bf16 %v1266_v13, %v2465_v39  ;;  %vm2889_vm4 = vcmask 121856  }
 0x8bd   : > { %v2044_v17 = vunpack.i.h.bf16 %v2042_v25  ;;  %v2043_v30 = vunpack.i.l.bf16 %v2042_v25  ;;  %v2049_v41 = vunpack.i.h.bf16 %v2047_v27  ;;  %v2048_v42 = vunpack.i.l.bf16 %v2047_v27  ;;  %vm2892_vm0 = vmmov %vm2889_vm4 }
 0x8be   : > { %1800 = vmatprep.subr.msk.bf16.mxu0 %vm2633_vm5, %v1798_v14  ;;  %v1806_v18 = vpack.c.bf16 %v1265_v34, %v2462_v37  ;;  %vm2893_vm2 = vcmask 7168   ;;  %v1820_v63 = vpack.c.bf16 %v1196_v50, %v2436_v23  ;;  %v1822_v4 = vpack.c.bf16 %v2610_v48, %v2434_v22 }
 0x8bf   : > { %v1216_v35 = vsel %vm2889_vm4, %v2043_v30, %v2044_v17  ;;  %1803 = vmatpush1.bf16.msk.msra.mxu0 %vm2643_vm14, %v1801_v24  ;;  %v1215_v39 = vsel %vm2892_vm0, %v2300_v43, %v2043_v30  ;;  %v1226_v0 = vsel %vm2893_vm2, %v2048_v42, %v2049_v41  ;;  %vm2896_vm4 = vmmov %vm2893_vm2  ;;  %vm2897_vm0 = vcmask 924672  }
 0x8c0   : > { %1805 = vmatprep.subr.bf16.mxu0 %v1804_v36  ;;  %v1808_v46 = vpack.c.bf16 %v1216_v35, %v2480_v54  ;;  %v2052_v47 = vpop.permute.xlu1 %2051  ;;  %v1811_v52 = vpack.c.bf16 %v1215_v39, %v2477_v53  ;;  %v1225_v7 = vsel %vm2896_vm4, %v2254_v19, %v2048_v42  ;;  %v1814_v54 = vpack.c.bf16 %v1226_v0, %v2487_v57  ;;  %v2057_v58 = vpop.permute.xlu0 %2056  ;;  %vm2898_vm2 = vmmov %vm2897_vm0 }
 0x8c1   : > { %v2053_v10 = vunpack.i.l.bf16 %v2052_v47  ;;  %v1817_v60 = vpack.c.bf16 %v1225_v7, %v2484_v56  ;;  %v2054_v61 = vunpack.i.h.bf16 %v2052_v47  ;;  %v2058_v1 = vunpack.i.l.bf16 %v2057_v58 }
 0x8c2   : > { %v2059_v56 = vunpack.i.h.bf16 %v2057_v58  ;;  %vm2899_vm4 = vcmask 916480  }
 0x8c3   : > { %1807 = vmatpush1.bf16.msra.mxu0 %v1806_v18  ;;  %v1236_v53 = vsel %vm450_vm13, %v2053_v10, %v2316_v49  ;;  %v1235_v5 = vsel %vm450_vm13, %v2054_v61, %v2053_v10  ;;  %v1246_v23 = vsel %vm2897_vm0, %v2058_v1, %v2341_v62  ;;  %vm2900_vm0 = vmmov %vm2899_vm4  ;;  %v1369_v61 = vld [vmem:[%s2815_s9] sm:$0x3] }
 0x8c4   : > { %1810 = vmatprep.subr.msk.bf16.mxu0 %vm2659_vm3, %v1808_v46  ;;  %v2062_v57 = vpop.permute.xlu1 %2061  ;;  %v1824_v11 = vpack.c.bf16 %v1236_v53, %v2500_v3  ;;  %v2067_v13 = vpop.permute.xlu0 %2066  ;;  %v1827_v14 = vpack.c.bf16 %v1235_v5, %v2496_v2  ;;  %v1245_v24 = vsel %vm2898_vm2, %v2059_v56, %v2058_v1  ;;  %v1830_v22 = vpack.c.bf16 %v1246_v23, %v2517_v16 }
 0x8c5   : > { %v2063_v50 = vunpack.i.l.bf16 %v2062_v57  ;;  %v2064_v48 = vunpack.i.h.bf16 %v2062_v57  ;;  %v2068_v25 = vunpack.i.l.bf16 %v2067_v13  ;;  %v1833_v27 = vpack.c.bf16 %v1245_v24, %v2513_v15 }
 0x8c6   : > { %v2069_v2 = vunpack.i.h.bf16 %v2067_v13  ;;  %vm2901_vm2 = vcmask 908288  }
 0x8c7   : > { %1813 = vmatpush1.bf16.msk.msra.mxu0 %vm2672_vm1, %v1811_v52  ;;  %v1274_v3 = vsel %vm2899_vm4, %v2063_v50, %v2318_v51  ;;  %v1273_v17 = vsel %vm2900_vm0, %v2064_v48, %v2063_v50  ;;  %v1256_v16 = vsel %vm2901_vm2, %v2068_v25, %v2353_v9  ;;  %vm2902_vm4 = vmmov %vm2901_vm2  ;;  %vm2907_vm0 = vcmask 121856  }
 0x8c8   : > { %1816 = vmatprep.subr.msk.bf16.mxu0 %vm2633_vm5, %v1814_v54  ;;  %v1836_v30 = vpack.c.bf16 %v1274_v3, %v2524_v21  ;;  %v1838_v34 = vpack.c.bf16 %v1273_v17, %v2520_v20  ;;  %v1255_v36 = vsel %vm2902_vm4, %v2069_v2, %v2068_v25  ;;  %v1840_v12 = vpack.c.bf16 %v1256_v16, %v2534_v28  ;;  %v1197_v21 = vld [vmem:[%s2813_s7] sm:$0xff]  ;;  %vm2908_vm2 = vmmov %vm2907_vm0 }
 0x8c9   : > { %v1843_v15 = vpack.c.bf16 %v1255_v36, %v2545_v31  ;;  %vm2909_vm4 = vcmask 7168  }
 0x8cb   : > { %1819 = vmatpush1.bf16.msk.msra.mxu0 %vm2643_vm14, %v1817_v60 }
 0x8cc   : > { %1821 = vmatprep.subr.bf16.mxu0 %v1820_v63 }
 0x8cf   : > { %1823 = vmatpush1.bf16.msra.mxu0 %v1822_v4 }
 0x8d0   : > { %1826 = vmatprep.subr.msk.bf16.mxu0 %vm2659_vm3, %v1824_v11 }
 0x8d3   : > { %1829 = vmatpush1.bf16.msk.msra.mxu0 %vm2672_vm1, %v1827_v14 }
 0x8d4   : > { %1832 = vmatprep.subr.msk.bf16.mxu0 %vm2633_vm5, %v1830_v22  ;;  %vm2903_vm5 = vcmask 130048  }
 0x8d7   : > { %1835 = vmatpush1.bf16.msk.msra.mxu0 %vm2643_vm14, %v1833_v27  ;;  %vm2904_vm14 = vmmov %vm2903_vm5 }
 0x8d8   : > { %1837 = vmatprep.subr.bf16.mxu0 %v1836_v30 }
 0x8db   : > { %1839 = vmatpush1.bf16.msra.mxu0 %v1838_v34 }
 0x8dc   : > { %1842 = vmatprep.subr.msk.bf16.mxu0 %vm2659_vm3, %v1840_v12  ;;  %vm2905_vm3 = vcmask 138240  }
 0x8df   : > { %1845 = vmatpush1.bf16.msk.msra.mxu0 %vm2672_vm1, %v1843_v15  ;;  %vm2906_vm1 = vmmov %vm2905_vm3 }
 0x8e2   : > { %1345 = vmatmul.mubr.f32.vlgmr.msra.gmra.mrb[4].mxu0 %v1197_v21 }
 0x9b5   : > { %v1346_v29 = vpop.f32.mrb[4].mxu0 }
 0x9b6   : > { %v1348_v20 = vpop.f32.mrb[5].mxu0  ;;  %v1355_v35 = vmul.f32 %v1346_v29, %v1346_v29 }
 0x9b7   : > { %v1356_v41 = vmul.f32 %v1348_v20, %v1348_v20  ;;  %v1351_v42 = vadd.f32 %v1348_v20, %v1346_v29 }
 0x9b9   : > { %1352 = vadd.xlane.f32.xlu1 %v1351_v42  ;;  %v1357_v28 = vadd.f32 %v1356_v41, %v1355_v35 }
 0x9bb   : > { %1358 = vadd.xlane.f32.xlu0 %v1357_v28 }
 0xa46   : > { %v1353_v18 = vpop.xlane.xlu1 %1352 }
 0xa47   : > { %v1354_v44 = vmul.f32 0.00390625, %v1353_v18 }
 0xa48   : > { %v1359_v39 = vpop.xlane.xlu0 %1358 }
 0xa49   : > { %v1360_v31 = vmul.f32 0.00390625, %v1359_v39  ;;  %v1363_v46 = vmul.f32 %v1354_v44, %v1354_v44  ;;  %v1361_v37 = vsub.f32 %v1346_v29, %v1354_v44  ;;  %v1362_v52 = vsub.f32 %v1348_v20, %v1354_v44 }
 0xa4b   : > { %v1364_v0 = vsub.f32 %v1360_v31, %v1363_v46 }
 0xa4d   : > { %v1365_v47 = vadd.f32 1e-05, %v1364_v0 }
 0xa4f   : > { %2113 = vrsqrt.f32 %v1365_v47 }
 0xa59   : > { %v2114_v7 = vpop.eup %2113 }
 0xa5a   : > { %v2725_v54 = vmul.f32 %v2114_v7, %v1361_v37  ;;  %v2727_v10 = vmul.f32 %v2114_v7, %v1362_v52 }
 0xa5c   : > { %v2075_v58 = vpack.i.bf16 %v2727_v10, %v2725_v54  ;;  %v2090_v60 = vpack.i.bf16 %v2725_v54, %v2727_v10 }
 0xa5e   : > { %2076 = vrot.lane.b32.xlu1 %v2075_v58, %s2125_s20  ;;  %2071 = vrot.lane.b32.xlu0 %v2075_v58, %s2124_s15 }
 0xa62   : > { %2081 = vrot.lane.b32.xlu1 %v2075_v58, %s2127_s22  ;;  %2086 = vrot.lane.b32.xlu0 %v2075_v58, %s2126_s21  ;;  %s1701_s22 = sshll.u32 %s2919_s14, 2 }
 0xa66   : > { %2091 = vrot.lane.b32.xlu1 %v2090_v60, %s2128_s23  ;;  %2096 = vrot.lane.b32.xlu0 %v2090_v60, %s2130_s25  ;;  %s359_s25 = scalar_lea.vmem %s2816_s10, %s1701_s22 }
 0xa6a   : > { %2101 = vrot.lane.b32.xlu1 %v2090_v60, %s2129_s24  ;;  %1425 = vrot.lane.b32.xlu0 %v2727_v10, %s2131_s26 }
 0xa6e   : > { %1423 = vrot.lane.b32.xlu1 %v2725_v54, %s2131_s26  ;;  %1451 = vperm.xlu0 %1959, %v1369_v61  }
 0xad0   : > { %v2077_v63 = vpop.permute.xlu1 %2076  ;;  %v2072_v53 = vpop.permute.xlu0 %2071 }
 0xad1   : > { %v2079_v1 = vunpack.i.h.bf16 %v2077_v63  ;;  %v2078_v57 = vunpack.i.l.bf16 %v2077_v63  ;;  %v2074_v4 = vunpack.i.h.bf16 %v2072_v53  ;;  %v2073_v5 = vunpack.i.l.bf16 %v2072_v53 }
 0xad3   : > { %v1437_v11 = vsel %vm2903_vm5, %v2244_v8, %v2078_v57  ;;  %v1438_v56 = vsel %vm2904_vm14, %v2078_v57, %v2079_v1  ;;  %v1377_v23 = vsel %vm2905_vm3, %v2242_v6, %v2073_v5  ;;  %v1378_v50 = vsel %vm2906_vm1, %v2073_v5, %v2074_v4  ;;  %vm2910_vm5 = vmmov %vm2909_vm4 }
 0xad4   : > { %v1846_v13 = vpack.c.bf16 %v1438_v56, %v1378_v50  ;;  %v1849_v14 = vpack.c.bf16 %v1437_v11, %v1377_v23  ;;  %v2082_v24 = vpop.permute.xlu1 %2081  ;;  %v2087_v22 = vpop.permute.xlu0 %2086 }
 0xad5   : > { %v2084_v48 = vunpack.i.h.bf16 %v2082_v24  ;;  %v2083_v25 = vunpack.i.l.bf16 %v2082_v24  ;;  %v2089_v3 = vunpack.i.h.bf16 %v2087_v22  ;;  %v2088_v27 = vunpack.i.l.bf16 %v2087_v22 }
 0xad6   : > { %1848 = vmatprep.subr.msk.bf16.mxu1 %vm2261_vm6, %v1846_v13 }
 0xad7   : > { %v1387_v8 = vsel %vm2907_vm0, %v2300_v43, %v2083_v25  ;;  %v1388_v17 = vsel %vm2908_vm2, %v2083_v25, %v2084_v48  ;;  %v1397_v6 = vsel %vm2909_vm4, %v2254_v19, %v2088_v27  ;;  %v1398_v2 = vsel %vm2910_vm5, %v2088_v27, %v2089_v3  ;;  %1851 = vmatpush1.bf16.msk.msra.mxu1 %vm2272_vm8, %v1849_v14 }
 0xad8   : > { %v1852_v30 = vpack.c.bf16 %v1398_v2, %v1388_v17  ;;  %v1855_v16 = vpack.c.bf16 %v1397_v6, %v1387_v8  ;;  %v2092_v34 = vpop.permute.xlu1 %2091  ;;  %v2097_v36 = vpop.permute.xlu0 %2096 }
 0xad9   : > { %v2094_v12 = vunpack.i.h.bf16 %v2092_v34  ;;  %v2093_v15 = vunpack.i.l.bf16 %v2092_v34  ;;  %v2099_v19 = vunpack.i.h.bf16 %v2097_v36  ;;  %v2098_v29 = vunpack.i.l.bf16 %v2097_v36 }
 0xada   : > { %1854 = vmatprep.subr.msk.bf16.mxu1 %vm2294_vm11, %v1852_v30  ;;  %vm2911_vm11 = vcmask 924672  }
 0xadb   : > { %v1407_v43 = vsel %vm450_vm13, %v2094_v12, %v2093_v15  ;;  %v1408_v21 = vsel %vm450_vm13, %v2093_v15, %v2316_v49  ;;  %1857 = vmatpush1.bf16.msk.msra.mxu1 %vm2308_vm12, %v1855_v16  ;;  %v1417_v40 = vsel %vm2911_vm11, %v2099_v19, %v2098_v29  ;;  %vm2912_vm14 = vmmov %vm2911_vm11  ;;  %vm2913_vm13 = vcmask 916480  }
 0xadc   : > { %v1858_v20 = vpack.c.bf16 %v1408_v21, %v2727_v10  ;;  %v1861_v35 = vpack.c.bf16 %v1407_v43, %v2725_v54  ;;  %v2102_v41 = vpop.permute.xlu1 %2101  ;;  %v1418_v49 = vsel %vm2912_vm14, %v2098_v29, %v2341_v62  ;;  %vm2914_vm3 = vmmov %vm2913_vm13  ;;  %v1426_v31 = vpop.permute.xlu0 %1425  ;;  %vm2915_vm12 = vcmask 908288  }
 0xadd   : > { %v2104_v42 = vunpack.i.h.bf16 %v2102_v41  ;;  %v2103_v28 = vunpack.i.l.bf16 %v2102_v41  ;;  %v1428_v55 = vsel %vm2915_vm12, %v1426_v31, %v2353_v9 }
 0xade   : > { %1860 = vmatprep.subr.msk.bf16.mxu1 %vm2326_vm15, %v1858_v20 }
 0xadf   : > { %v1445_v18 = vsel %vm2913_vm13, %v2104_v42, %v2103_v28  ;;  %v1446_v45 = vsel %vm2914_vm3, %v2103_v28, %v2318_v51  ;;  %1863 = vmatpush1.bf16.msk.msra.mxu1 %vm2335_vm7, %v1861_v35  ;;  %v1370_v51 = vld [vmem:[%s2814_s8] sm:$0x3]  ;;  %vm2916_vm7 = vmmov %vm2915_vm12 }
 0xae0   : > { %v1864_v44 = vpack.c.bf16 %v1446_v45, %v1418_v49  ;;  %v1867_v39 = vpack.c.bf16 %v1445_v18, %v1417_v40  ;;  %v1424_v46 = vpop.permute.xlu1 %1423 }
 0xae1   : > { %v1427_v59 = vsel %vm2916_vm7, %v1424_v46, %v1426_v31 }
 0xae2   : > { %1866 = vmatprep.subr.msk.bf16.mxu1 %vm2261_vm6, %v1864_v44  ;;  %vm2917_vm6 = vcmask 588800  }
 0xae3   : > { %1869 = vmatpush1.bf16.msk.msra.mxu1 %vm2272_vm8, %v1867_v39 }
 0xae4   : > { %1694 = vmatprep.subr.msk.mxu1 %vm2276_vm9, %v1428_v55 }
 0xae7   : > { %1695 = vmatpush1.msk.msra.mxu1 %vm2283_vm10, %v1427_v59 }
 0xae8   : > { %1696 = vmatmul.mubr.msk.f32.vlgmr.msra.gmra.mrb[6].mxu1 %vm2917_vm6, %v1370_v51 }
 0xaed   : > { %v1452_v26 = vpop.permute.xlu0 %1451 }
 0xbbb   : > { %v1523_v62 = vpop.f32.mrb[6].mxu1 }
 0xbbc   : > { %v1524_v9 = vadd.f32 %v1523_v62, %v1452_v26  ;;  %v1525_v0 = vpop.f32.mrb[7].mxu1 }
 0xbbd   : > { %v1526_v32 = vadd.f32 %v1525_v0, %v1452_v26 }
 0xbbe   : > { %v1528_v33 = vadd.f32 %v1524_v9, %v2725_v54 }
 0xbbf   : > { %v1529_v47 = vadd.f32 %v1526_v32, %v2727_v10 }
 0xbc1   : > { %v1532_v37 = vcombine.low %v1528_v33, %v1529_v47 }
 0xbc3   : > { %1697 = vst.sshfl [vmem:[%s359_s25] sm:$0x33 pattern:$0x76325410] %v1532_v37 }
 0xbc4 PF: > { %s20_s13 = sadd.s32 1, %s2121_s13  }
 0xbc5   : > { %p17_p4 = scmp.ge.s32.totalorder %s20_s13, 4  }
 0xbc7   :  { %19 = sbr.rel (!%p17_p4) target bundleno = 1 (0x1), region = 90 }

</bundles_post_ra>
